<compile_context>
chip_gen: v7x
topology: tpu7x:2x2x1
jax: 0.10.0
libtpu: 0.0.40
codegen_flags: <defaults>
</compile_context>

<pallas_src>
import math

import jax
import jax.numpy as jnp
from jax.experimental import pallas as pl
from jax.experimental.pallas import tpu as pltpu


def _make_divisible(v, divisor, min_value=None):
    if min_value is None:
        min_value = divisor
    new_v = max(min_value, int(v + divisor / 2) // divisor * divisor)
    if new_v < 0.9 * v:
        new_v += divisor
    return new_v


# ----------------------------------------------------------------------------
# Parameter slab: every weight / shift packed into one (Chid, 128) f32 operand.
# BN scales are folded into the conv weights here (one-time XLA-side work).
# ----------------------------------------------------------------------------
def _slab_offsets(Cin, Chid, Oup, Cse, K):
    off = {}
    c = 0
    for name, width in (("w1", Cin), ("wdw", K * K), ("w2", Chid),
                        ("sw1", Chid), ("sw2", Cse),
                        ("bn1b", 1), ("bn2b", 1), ("bn3b", 1),
                        ("sb1", 1), ("sb2", 1)):
        off[name] = c
        c += width
    ncol = ((c + 127) // 128) * 128          # lane-aligned -> unmasked loads
    return off, ncol


def _build_slab(p, Cin, Chid, Oup, Cse, K):
    off, ncol = _slab_offsets(Cin, Chid, Oup, Cse, K)
    slab = jnp.zeros((Chid, ncol), jnp.float32)
    # Fold eval-mode BN scales into the conv weights.
    w1f = p["w1"] * p["bn1s"][:, None]                          # (Chid, Cin)
    wdwf = (p["wdw"] * p["bn2s"][:, None, None]).reshape(Chid, K * K)
    w2f = p["w2"] * p["bn3s"][:, None]                          # (Oup, Chid)
    slab = slab.at[:, off["w1"]:off["w1"] + Cin].set(w1f)
    slab = slab.at[:, off["wdw"]:off["wdw"] + K * K].set(wdwf)
    slab = slab.at[:Oup, off["w2"]:off["w2"] + Chid].set(w2f)
    slab = slab.at[:Cse, off["sw1"]:off["sw1"] + Chid].set(p["sw1"])
    slab = slab.at[:, off["sw2"]:off["sw2"] + Cse].set(p["sw2"])
    slab = slab.at[:, off["bn1b"]].set(p["bn1b"])
    slab = slab.at[:, off["bn2b"]].set(p["bn2b"])
    slab = slab.at[:Oup, off["bn3b"]].set(p["bn3b"])
    slab = slab.at[:Cse, off["sb1"]].set(p["sb1"])
    slab = slab.at[:, off["sb2"]].set(p["sb2"])
    return slab, off


# ----------------------------------------------------------------------------
# Pallas kernel: single grid step, data layout (C, B*H*W) -- batch in lanes.
# ----------------------------------------------------------------------------
def _make_kernel(B, H, W, Cin, Chid, Oup, Cse, K, off):
    HW = H * W
    BHW = B * HW
    pad = (K - 1) // 2
    w_pow2 = (W & (W - 1)) == 0
    hw_pow2 = (HW & (HW - 1)) == 0

    def h_swish(v):
        return v * (jnp.clip(v + 3.0, 0.0, 6.0) * (1.0 / 6.0))

    def kernel(x_ref, slab_ref, o_ref):
        x = x_ref[...]                                              # (Cin, BHW)

        # ---- hoisted parameter loads (one slice each, before the hot loops) -
        w1f = slab_ref[:, off["w1"]:off["w1"] + Cin]                # (Chid, Cin)
        taps = slab_ref[:, off["wdw"]:off["wdw"] + K * K]           # (Chid, K*K)
        w2f = slab_ref[:Oup, off["w2"]:off["w2"] + Chid]            # (Oup, Chid)
        sw1 = slab_ref[:Cse, off["sw1"]:off["sw1"] + Chid]          # (Cse, Chid)
        sw2 = slab_ref[:, off["sw2"]:off["sw2"] + Cse]              # (Chid, Cse)
        bn1b = slab_ref[:, off["bn1b"]:off["bn1b"] + 1]             # (Chid, 1)
        bn2b = slab_ref[:, off["bn2b"]:off["bn2b"] + 1]             # (Chid, 1)
        bn3b = slab_ref[:Oup, off["bn3b"]:off["bn3b"] + 1]          # (Oup, 1)
        sb1 = slab_ref[:Cse, off["sb1"]:off["sb1"] + 1]             # (Cse, 1)
        sb2 = slab_ref[:, off["sb2"]:off["sb2"] + 1]                # (Chid, 1)

        # Within-image positions (batch folded into lanes: lane = b*HW + y*W + x)
        pos = jax.lax.broadcasted_iota(jnp.int32, (1, BHW), 1)      # global lane
        pos_in = jnp.bitwise_and(pos, HW - 1) if hw_pow2 else pos % HW
        ww = jnp.bitwise_and(pos_in, W - 1) if w_pow2 else pos_in % W

        # ---- 1x1 expand conv (BN1 scale folded) + shift + h_swish ----------
        h = jnp.dot(w1f, x, preferred_element_type=jnp.float32)     # (Chid, BHW)
        h = h_swish(h + bn1b)

        # ---- depthwise KxK conv, stride 1, SAME padding ---------------------
        # Row-shifted + row-masked copies built once (dy pass); the inner kx
        # loop applies only +-pad lane rolls and the column mask.  Roll wrap
        # across the batch seam is confined to lanes the edge masks zero out.
        rows = []
        for ky in range(K):
            dy = ky - pad
            if dy == 0:
                rows.append(h)
            else:
                r = pltpu.roll(h, shift=(-(dy * W)) % BHW, axis=1)
                vy = (pos_in >= (-dy) * W) if dy < 0 else (pos_in < HW - dy * W)
                rows.append(jnp.where(vy, r, 0.0))

        acc = jnp.zeros((Chid, BHW), jnp.float32)
        for ky in range(K):
            base = rows[ky]
            for kx in range(K):
                dx = kx - pad
                c0 = ky * K + kx
                tap = taps[:, c0:c0 + 1]                            # (Chid, 1)
                if dx == 0:
                    src = base
                else:
                    src = pltpu.roll(base, shift=(-dx) % BHW, axis=1)
                    vx = (ww >= -dx) if dx < 0 else (ww < W - dx)
                    src = jnp.where(vx, src, 0.0)
                acc = acc + src * tap
        acc = acc + bn2b                                            # BN2 shift

        # ---- SE: per-image avg pool -> fc -> relu -> fc -> h_sigmoid -> scale
        img_masks = [(pos >= b * HW) & (pos < (b + 1) * HW) for b in range(B)]
        pooled = jnp.concatenate(
            [jnp.sum(jnp.where(m, acc, 0.0), axis=1, keepdims=True)
             for m in img_masks], axis=1) * (1.0 / HW)              # (Chid, B)
        s = jnp.dot(sw1, pooled, preferred_element_type=jnp.float32) + sb1
        s = jnp.maximum(s, 0.0)                                     # (Cse, B)
        s = jnp.dot(sw2, s, preferred_element_type=jnp.float32) + sb2
        s = jnp.clip(s + 3.0, 0.0, 6.0) * (1.0 / 6.0)               # (Chid, B)
        scale = jnp.zeros((Chid, BHW), jnp.float32)
        for b in range(B):
            scale = jnp.where(img_masks[b], s[:, b:b + 1], scale)
        acc = acc * scale

        # ---- second h_swish --------------------------------------------------
        acc = h_swish(acc)

        # ---- 1x1 project conv (BN3 scale folded) + shift + identity residual -
        out = jnp.dot(w2f, acc, preferred_element_type=jnp.float32) + bn3b
        o_ref[...] = (out + x).astype(o_ref.dtype)

    return kernel


# ----------------------------------------------------------------------------
# Wrapper: fold batch into the lane axis, single fused grid step.
# ----------------------------------------------------------------------------
def inverted_residual(x_nchw, params):
    B, Cin, H, W = x_nchw.shape
    Chid = params["w1"].shape[0]
    Oup = params["w2"].shape[0]
    Cse = params["sw1"].shape[0]
    K = params["wdw"].shape[-1]
    HW, BHW = H * W, B * H * W

    # Implemented config: stride=1, SAME padding, identity residual.
    assert Cin == Oup, "kernel implements the identity-residual config (stride=1, inp==oup)"
    assert K % 2 == 1, "kernel implements SAME padding ((K-1)//2) only"
    assert BHW % 128 == 0 and Cin % 8 == 0 and Chid % 8 == 0, "tile alignment"

    slab, off = _build_slab(params, Cin, Chid, Oup, Cse, K)
    ncol = slab.shape[1]
    kernel = _make_kernel(B, H, W, Cin, Chid, Oup, Cse, K, off)

    # Fold batch into the lane axis: (B, Cin, H, W) -> (Cin, B*H*W).
    x2d = jnp.transpose(x_nchw.reshape(B, Cin, HW), (1, 0, 2)).reshape(Cin, BHW)

    out2d = pl.pallas_call(
        kernel,
        out_shape=jax.ShapeDtypeStruct((Oup, BHW), x_nchw.dtype),
        grid_spec=pltpu.PrefetchScalarGridSpec(
            num_scalar_prefetch=0,
            grid=(1,),                                   # single fused step
            in_specs=[
                pl.BlockSpec((Cin, BHW), lambda i: (0, 0)),
                pl.BlockSpec((Chid, ncol), lambda i: (0, 0)),
            ],
            out_specs=pl.BlockSpec((Oup, BHW), lambda i: (0, 0)),
        ),
        compiler_params=pltpu.CompilerParams(
            dimension_semantics=("arbitrary",)),
        input_output_aliases={0: 0},   # residual output reuses x's HBM buffer
    )(x2d, slab)

    return jnp.transpose(out2d.reshape(Oup, B, HW), (1, 0, 2)).reshape(B, Oup, H, W)


# ----------------------------------------------------------------------------
# Pure-JAX reference in NCHW with UNFOLDED BN params (independent check).
# ----------------------------------------------------------------------------
def reference_nchw(x, p):
    Chid = p["w1"].shape[0]
    K = p["wdw"].shape[-1]
    h = jnp.einsum("oc,bchw->bohw", p["w1"], x)
    h = h * p["bn1s"][None, :, None, None] + p["bn1b"][None, :, None, None]
    h = h * jnp.clip(h + 3.0, 0.0, 6.0) / 6.0
    h = jax.lax.conv_general_dilated(
        h, p["wdw"].reshape(Chid, 1, K, K), (1, 1), "SAME",
        dimension_numbers=("NCHW", "OIHW", "NCHW"),
        feature_group_count=Chid)
    h = h * p["bn2s"][None, :, None, None] + p["bn2b"][None, :, None, None]
    pooled = h.mean(axis=(2, 3))                                  # (B, Chid)
    s = jnp.maximum(pooled @ p["sw1"].T + p["sb1"], 0.0)
    s = s @ p["sw2"].T + p["sb2"]
    s = jnp.clip(s + 3.0, 0.0, 6.0) / 6.0
    h = h * s[:, :, None, None]
    h = h * jnp.clip(h + 3.0, 0.0, 6.0) / 6.0
    out = jnp.einsum("oc,bchw->bohw", p["w2"], h)
    out = out * p["bn3s"][None, :, None, None] + p["bn3b"][None, :, None, None]
    return out + x


if __name__ == "__main__":
    inp, hidden_dim, oup = 8, 16, 8
    kernel_size, stride = 3, 1
    B, H, W = 2, 16, 16
    Cse = _make_divisible(hidden_dim // 4, 8)          # SE squeeze width = 8

    key = jax.random.PRNGKey(0)
    keys = jax.random.split(key, 12)

    def nrm(k, shape, scale):
        return jax.random.normal(k, shape, jnp.float32) * scale

    # Conv / linear weights in PyTorch conventions (out-channel first).
    params = {
        "w1":  nrm(keys[0], (hidden_dim, inp), 1.0 / math.sqrt(inp)),
        "wdw": nrm(keys[1], (hidden_dim, kernel_size, kernel_size),
                   1.0 / kernel_size),
        "sw1": nrm(keys[2], (Cse, hidden_dim), 1.0 / math.sqrt(hidden_dim)),
        "sb1": nrm(keys[3], (Cse,), 0.1),
        "sw2": nrm(keys[4], (hidden_dim, Cse), 1.0 / math.sqrt(Cse)),
        "sb2": nrm(keys[5], (hidden_dim,), 0.1),
        "w2":  nrm(keys[6], (oup, hidden_dim), 1.0 / math.sqrt(hidden_dim)),
    }
    # Eval-mode BatchNorm folded to per-channel scale/shift:
    #   scale = gamma / sqrt(var + eps), shift = beta - mean * scale
    eps = 1e-5
    for name, c, k0 in (("bn1", hidden_dim, 7), ("bn2", hidden_dim, 8),
                        ("bn3", oup, 9)):
        gamma = 1.0 + 0.1 * jax.random.normal(keys[k0], (c,), jnp.float32)
        beta = 0.05 * jax.random.normal(jax.random.fold_in(keys[k0], 1), (c,), jnp.float32)
        mean = 0.02 * jax.random.normal(jax.random.fold_in(keys[k0], 2), (c,), jnp.float32)
        var = jnp.abs(1.0 + 0.1 * jax.random.normal(jax.random.fold_in(keys[k0], 3), (c,), jnp.float32))
        scale = gamma / jnp.sqrt(var + eps)
        params[name + "s"] = scale
        params[name + "b"] = beta - mean * scale

    # Input in PyTorch-native NCHW.
    x_nchw = jax.random.normal(keys[10], (B, inp, H, W), jnp.float32)

    out = inverted_residual(x_nchw, params)
    out = jax.block_until_ready(out)

    ref = reference_nchw(x_nchw, params)
    assert out.shape == (B, oup, H, W)
    max_err = float(jnp.max(jnp.abs(out - ref)))
    assert jnp.allclose(out, ref, atol=1e-4, rtol=1e-4), max_err

    print("KERNEL_OK")
</pallas_src>

<mosaic_0001>
module attributes {stable_mosaic.version = 11 : i64} {
  func.func @kernel(%arg0: i32, %arg1: memref<8x512xf32, #tpu.memory_space<vmem>>, %arg2: memref<16x128xf32, #tpu.memory_space<vmem>>, %arg3: memref<8x512xf32, #tpu.memory_space<vmem>>) attributes {dimension_semantics = [#tpu.dimension_semantics<arbitrary>], iteration_bounds = array<i64: 1>, scalar_prefetch = 0 : i64, scratch_operands = 0 : i64, tpu.core_type = #tpu.core_type<tc>, window_params = [{pipeline_mode = #tpu.pipeline_mode<synchronous>, transform_indices = @transform_0, window_bounds = array<i64: 8, 512>}, {pipeline_mode = #tpu.pipeline_mode<synchronous>, transform_indices = @transform_1, window_bounds = array<i64: 16, 128>}, {pipeline_mode = #tpu.pipeline_mode<synchronous>, transform_indices = @transform_2, window_bounds = array<i64: 8, 512>}]} {
    %c0 = arith.constant 0 : index
    %c0_0 = arith.constant 0 : index
    %0 = vector.load %arg1[%c0, %c0_0] : memref<8x512xf32, #tpu.memory_space<vmem>>, vector<8x512xf32>
    %c0_1 = arith.constant 0 : index
    %c0_2 = arith.constant 0 : index
    %1 = vector.load %arg2[%c0_1, %c0_2] : memref<16x128xf32, #tpu.memory_space<vmem>>, vector<16x8xf32>
    %c0_3 = arith.constant 0 : index
    %c8 = arith.constant 8 : index
    %2 = vector.load %arg2[%c0_3, %c8] : memref<16x128xf32, #tpu.memory_space<vmem>>, vector<16x9xf32>
    %c0_4 = arith.constant 0 : index
    %c17 = arith.constant 17 : index
    %3 = vector.load %arg2[%c0_4, %c17] : memref<16x128xf32, #tpu.memory_space<vmem>>, vector<8x16xf32>
    %c0_5 = arith.constant 0 : index
    %c33 = arith.constant 33 : index
    %4 = vector.load %arg2[%c0_5, %c33] : memref<16x128xf32, #tpu.memory_space<vmem>>, vector<8x16xf32>
    %c0_6 = arith.constant 0 : index
    %c49 = arith.constant 49 : index
    %5 = vector.load %arg2[%c0_6, %c49] : memref<16x128xf32, #tpu.memory_space<vmem>>, vector<16x8xf32>
    %c0_7 = arith.constant 0 : index
    %c57 = arith.constant 57 : index
    %6 = vector.load %arg2[%c0_7, %c57] : memref<16x128xf32, #tpu.memory_space<vmem>>, vector<16x1xf32>
    %c0_8 = arith.constant 0 : index
    %c58 = arith.constant 58 : index
    %7 = vector.load %arg2[%c0_8, %c58] : memref<16x128xf32, #tpu.memory_space<vmem>>, vector<16x1xf32>
    %c0_9 = arith.constant 0 : index
    %c59 = arith.constant 59 : index
    %8 = vector.load %arg2[%c0_9, %c59] : memref<16x128xf32, #tpu.memory_space<vmem>>, vector<8x1xf32>
    %c0_10 = arith.constant 0 : index
    %c60 = arith.constant 60 : index
    %9 = vector.load %arg2[%c0_10, %c60] : memref<16x128xf32, #tpu.memory_space<vmem>>, vector<8x1xf32>
    %c0_11 = arith.constant 0 : index
    %c61 = arith.constant 61 : index
    %10 = vector.load %arg2[%c0_11, %c61] : memref<16x128xf32, #tpu.memory_space<vmem>>, vector<16x1xf32>
    %11 = tpu.iota {dimensions = array<i32: 1>} : vector<1x512xi32>
    %c255_i32 = arith.constant 255 : i32
    %12 = vector.broadcast %c255_i32 : i32 to vector<1x512xi32>
    %13 = arith.andi %11, %12 : vector<1x512xi32>
    %c15_i32 = arith.constant 15 : i32
    %14 = vector.broadcast %c15_i32 : i32 to vector<1x512xi32>
    %15 = arith.andi %13, %14 : vector<1x512xi32>
    %cst = arith.constant dense<0.000000e+00> : vector<16x512xf32>
    %16 = tpu.matmul %1, %0, %cst {dimension_numbers = #tpu.dot_dimension_numbers<[1], [0], [0], [1], [0, 0, 1, 1], [], []>} : vector<16x8xf32>, vector<8x512xf32>, vector<16x512xf32> -> vector<16x512xf32>
    %17 = vector.broadcast %6 : vector<16x1xf32> to vector<16x512xf32>
    %18 = arith.addf %16, %17 : vector<16x512xf32>
    %cst_12 = arith.constant 3.000000e+00 : f32
    %19 = vector.broadcast %cst_12 : f32 to vector<16x512xf32>
    %20 = arith.addf %18, %19 : vector<16x512xf32>
    %cst_13 = arith.constant 0.000000e+00 : f32
    %cst_14 = arith.constant 6.000000e+00 : f32
    %21 = vector.broadcast %cst_13 : f32 to vector<16x512xf32>
    %22 = arith.maximumf %21, %20 : vector<16x512xf32>
    %23 = vector.broadcast %cst_14 : f32 to vector<16x512xf32>
    %24 = arith.minimumf %23, %22 : vector<16x512xf32>
    %cst_15 = arith.constant 0.166666672 : f32
    %25 = vector.broadcast %cst_15 : f32 to vector<16x512xf32>
    %26 = arith.mulf %24, %25 : vector<16x512xf32>
    %27 = arith.mulf %18, %26 : vector<16x512xf32>
    %c16_i32 = arith.constant 16 : i32
    %28 = tpu.dynamic_rotate %27 by %c16_i32 dim 1 : vector<16x512xf32>, i32 -> vector<16x512xf32>
    %c16_i32_16 = arith.constant 16 : i32
    %29 = vector.broadcast %c16_i32_16 : i32 to vector<1x512xi32>
    %30 = arith.cmpi sge, %13, %29 : vector<1x512xi32>
    %cst_17 = arith.constant 0.000000e+00 : f32
    %31 = vector.shape_cast %30 : vector<1x512xi1> to vector<1x512xi1>
    %32 = vector.broadcast %31 : vector<1x512xi1> to vector<16x512xi1>
    %33 = vector.broadcast %cst_17 : f32 to vector<16x512xf32>
    %34 = arith.select %32, %28, %33 : vector<16x512xi1>, vector<16x512xf32>
    %c496_i32 = arith.constant 496 : i32
    %35 = tpu.dynamic_rotate %27 by %c496_i32 dim 1 : vector<16x512xf32>, i32 -> vector<16x512xf32>
    %c240_i32 = arith.constant 240 : i32
    %36 = vector.broadcast %c240_i32 : i32 to vector<1x512xi32>
    %37 = arith.cmpi slt, %13, %36 : vector<1x512xi32>
    %cst_18 = arith.constant 0.000000e+00 : f32
    %38 = vector.shape_cast %37 : vector<1x512xi1> to vector<1x512xi1>
    %39 = vector.broadcast %38 : vector<1x512xi1> to vector<16x512xi1>
    %40 = vector.broadcast %cst_18 : f32 to vector<16x512xf32>
    %41 = arith.select %39, %35, %40 : vector<16x512xi1>, vector<16x512xf32>
    %cst_19 = arith.constant 0.000000e+00 : f32
    %42 = vector.broadcast %cst_19 : f32 to vector<16x512xf32>
    %43 = vector.extract_strided_slice %2 {offsets = [0, 0], sizes = [16, 1], strides = [1, 1]} : vector<16x9xf32> to vector<16x1xf32>
    %c1_i32 = arith.constant 1 : i32
    %44 = tpu.dynamic_rotate %34 by %c1_i32 dim 1 : vector<16x512xf32>, i32 -> vector<16x512xf32>
    %c1_i32_20 = arith.constant 1 : i32
    %45 = vector.broadcast %c1_i32_20 : i32 to vector<1x512xi32>
    %46 = arith.cmpi sge, %15, %45 : vector<1x512xi32>
    %cst_21 = arith.constant 0.000000e+00 : f32
    %47 = vector.shape_cast %46 : vector<1x512xi1> to vector<1x512xi1>
    %48 = vector.broadcast %47 : vector<1x512xi1> to vector<16x512xi1>
    %49 = vector.broadcast %cst_21 : f32 to vector<16x512xf32>
    %50 = arith.select %48, %44, %49 : vector<16x512xi1>, vector<16x512xf32>
    %51 = vector.broadcast %43 : vector<16x1xf32> to vector<16x512xf32>
    %52 = arith.mulf %50, %51 : vector<16x512xf32>
    %53 = arith.addf %42, %52 : vector<16x512xf32>
    %54 = vector.extract_strided_slice %2 {offsets = [0, 1], sizes = [16, 1], strides = [1, 1]} : vector<16x9xf32> to vector<16x1xf32>
    %55 = vector.broadcast %54 : vector<16x1xf32> to vector<16x512xf32>
    %56 = arith.mulf %34, %55 : vector<16x512xf32>
    %57 = arith.addf %53, %56 : vector<16x512xf32>
    %58 = vector.extract_strided_slice %2 {offsets = [0, 2], sizes = [16, 1], strides = [1, 1]} : vector<16x9xf32> to vector<16x1xf32>
    %c511_i32 = arith.constant 511 : i32
    %59 = tpu.dynamic_rotate %34 by %c511_i32 dim 1 : vector<16x512xf32>, i32 -> vector<16x512xf32>
    %c15_i32_22 = arith.constant 15 : i32
    %60 = vector.broadcast %c15_i32_22 : i32 to vector<1x512xi32>
    %61 = arith.cmpi slt, %15, %60 : vector<1x512xi32>
    %cst_23 = arith.constant 0.000000e+00 : f32
    %62 = vector.shape_cast %61 : vector<1x512xi1> to vector<1x512xi1>
    %63 = vector.broadcast %62 : vector<1x512xi1> to vector<16x512xi1>
    %64 = vector.broadcast %cst_23 : f32 to vector<16x512xf32>
    %65 = arith.select %63, %59, %64 : vector<16x512xi1>, vector<16x512xf32>
    %66 = vector.broadcast %58 : vector<16x1xf32> to vector<16x512xf32>
    %67 = arith.mulf %65, %66 : vector<16x512xf32>
    %68 = arith.addf %57, %67 : vector<16x512xf32>
    %69 = vector.extract_strided_slice %2 {offsets = [0, 3], sizes = [16, 1], strides = [1, 1]} : vector<16x9xf32> to vector<16x1xf32>
    %c1_i32_24 = arith.constant 1 : i32
    %70 = tpu.dynamic_rotate %27 by %c1_i32_24 dim 1 : vector<16x512xf32>, i32 -> vector<16x512xf32>
    %c1_i32_25 = arith.constant 1 : i32
    %71 = vector.broadcast %c1_i32_25 : i32 to vector<1x512xi32>
    %72 = arith.cmpi sge, %15, %71 : vector<1x512xi32>
    %cst_26 = arith.constant 0.000000e+00 : f32
    %73 = vector.shape_cast %72 : vector<1x512xi1> to vector<1x512xi1>
    %74 = vector.broadcast %73 : vector<1x512xi1> to vector<16x512xi1>
    %75 = vector.broadcast %cst_26 : f32 to vector<16x512xf32>
    %76 = arith.select %74, %70, %75 : vector<16x512xi1>, vector<16x512xf32>
    %77 = vector.broadcast %69 : vector<16x1xf32> to vector<16x512xf32>
    %78 = arith.mulf %76, %77 : vector<16x512xf32>
    %79 = arith.addf %68, %78 : vector<16x512xf32>
    %80 = vector.extract_strided_slice %2 {offsets = [0, 4], sizes = [16, 1], strides = [1, 1]} : vector<16x9xf32> to vector<16x1xf32>
    %81 = vector.broadcast %80 : vector<16x1xf32> to vector<16x512xf32>
    %82 = arith.mulf %27, %81 : vector<16x512xf32>
    %83 = arith.addf %79, %82 : vector<16x512xf32>
    %84 = vector.extract_strided_slice %2 {offsets = [0, 5], sizes = [16, 1], strides = [1, 1]} : vector<16x9xf32> to vector<16x1xf32>
    %c511_i32_27 = arith.constant 511 : i32
    %85 = tpu.dynamic_rotate %27 by %c511_i32_27 dim 1 : vector<16x512xf32>, i32 -> vector<16x512xf32>
    %c15_i32_28 = arith.constant 15 : i32
    %86 = vector.broadcast %c15_i32_28 : i32 to vector<1x512xi32>
    %87 = arith.cmpi slt, %15, %86 : vector<1x512xi32>
    %cst_29 = arith.constant 0.000000e+00 : f32
    %88 = vector.shape_cast %87 : vector<1x512xi1> to vector<1x512xi1>
    %89 = vector.broadcast %88 : vector<1x512xi1> to vector<16x512xi1>
    %90 = vector.broadcast %cst_29 : f32 to vector<16x512xf32>
    %91 = arith.select %89, %85, %90 : vector<16x512xi1>, vector<16x512xf32>
    %92 = vector.broadcast %84 : vector<16x1xf32> to vector<16x512xf32>
    %93 = arith.mulf %91, %92 : vector<16x512xf32>
    %94 = arith.addf %83, %93 : vector<16x512xf32>
    %95 = vector.extract_strided_slice %2 {offsets = [0, 6], sizes = [16, 1], strides = [1, 1]} : vector<16x9xf32> to vector<16x1xf32>
    %c1_i32_30 = arith.constant 1 : i32
    %96 = tpu.dynamic_rotate %41 by %c1_i32_30 dim 1 : vector<16x512xf32>, i32 -> vector<16x512xf32>
    %c1_i32_31 = arith.constant 1 : i32
    %97 = vector.broadcast %c1_i32_31 : i32 to vector<1x512xi32>
    %98 = arith.cmpi sge, %15, %97 : vector<1x512xi32>
    %cst_32 = arith.constant 0.000000e+00 : f32
    %99 = vector.shape_cast %98 : vector<1x512xi1> to vector<1x512xi1>
    %100 = vector.broadcast %99 : vector<1x512xi1> to vector<16x512xi1>
    %101 = vector.broadcast %cst_32 : f32 to vector<16x512xf32>
    %102 = arith.select %100, %96, %101 : vector<16x512xi1>, vector<16x512xf32>
    %103 = vector.broadcast %95 : vector<16x1xf32> to vector<16x512xf32>
    %104 = arith.mulf %102, %103 : vector<16x512xf32>
    %105 = arith.addf %94, %104 : vector<16x512xf32>
    %106 = vector.extract_strided_slice %2 {offsets = [0, 7], sizes = [16, 1], strides = [1, 1]} : vector<16x9xf32> to vector<16x1xf32>
    %107 = vector.broadcast %106 : vector<16x1xf32> to vector<16x512xf32>
    %108 = arith.mulf %41, %107 : vector<16x512xf32>
    %109 = arith.addf %105, %108 : vector<16x512xf32>
    %110 = vector.extract_strided_slice %2 {offsets = [0, 8], sizes = [16, 1], strides = [1, 1]} : vector<16x9xf32> to vector<16x1xf32>
    %c511_i32_33 = arith.constant 511 : i32
    %111 = tpu.dynamic_rotate %41 by %c511_i32_33 dim 1 : vector<16x512xf32>, i32 -> vector<16x512xf32>
    %c15_i32_34 = arith.constant 15 : i32
    %112 = vector.broadcast %c15_i32_34 : i32 to vector<1x512xi32>
    %113 = arith.cmpi slt, %15, %112 : vector<1x512xi32>
    %cst_35 = arith.constant 0.000000e+00 : f32
    %114 = vector.shape_cast %113 : vector<1x512xi1> to vector<1x512xi1>
    %115 = vector.broadcast %114 : vector<1x512xi1> to vector<16x512xi1>
    %116 = vector.broadcast %cst_35 : f32 to vector<16x512xf32>
    %117 = arith.select %115, %111, %116 : vector<16x512xi1>, vector<16x512xf32>
    %118 = vector.broadcast %110 : vector<16x1xf32> to vector<16x512xf32>
    %119 = arith.mulf %117, %118 : vector<16x512xf32>
    %120 = arith.addf %109, %119 : vector<16x512xf32>
    %121 = vector.broadcast %7 : vector<16x1xf32> to vector<16x512xf32>
    %122 = arith.addf %120, %121 : vector<16x512xf32>
    %c0_i32 = arith.constant 0 : i32
    %123 = vector.broadcast %c0_i32 : i32 to vector<1x512xi32>
    %124 = arith.cmpi sge, %11, %123 : vector<1x512xi32>
    %c256_i32 = arith.constant 256 : i32
    %125 = vector.broadcast %c256_i32 : i32 to vector<1x512xi32>
    %126 = arith.cmpi slt, %11, %125 : vector<1x512xi32>
    %127 = arith.andi %124, %126 : vector<1x512xi1>
    %c256_i32_36 = arith.constant 256 : i32
    %128 = vector.broadcast %c256_i32_36 : i32 to vector<1x512xi32>
    %129 = arith.cmpi sge, %11, %128 : vector<1x512xi32>
    %c512_i32 = arith.constant 512 : i32
    %130 = vector.broadcast %c512_i32 : i32 to vector<1x512xi32>
    %131 = arith.cmpi slt, %11, %130 : vector<1x512xi32>
    %132 = arith.andi %129, %131 : vector<1x512xi1>
    %cst_37 = arith.constant 0.000000e+00 : f32
    %133 = vector.shape_cast %127 : vector<1x512xi1> to vector<1x512xi1>
    %134 = vector.broadcast %133 : vector<1x512xi1> to vector<16x512xi1>
    %135 = vector.broadcast %cst_37 : f32 to vector<16x512xf32>
    %136 = arith.select %134, %122, %135 : vector<16x512xi1>, vector<16x512xf32>
    %cst_38 = arith.constant dense<0.000000e+00> : vector<16xf32>
    %137 = vector.multi_reduction <add>, %136, %cst_38 [1] : vector<16x512xf32> to vector<16xf32>
    %138 = vector.shape_cast %137 : vector<16xf32> to vector<16x1xf32>
    %cst_39 = arith.constant 0.000000e+00 : f32
    %139 = vector.shape_cast %132 : vector<1x512xi1> to vector<1x512xi1>
    %140 = vector.broadcast %139 : vector<1x512xi1> to vector<16x512xi1>
    %141 = vector.broadcast %cst_39 : f32 to vector<16x512xf32>
    %142 = arith.select %140, %122, %141 : vector<16x512xi1>, vector<16x512xf32>
    %cst_40 = arith.constant dense<0.000000e+00> : vector<16xf32>
    %143 = vector.multi_reduction <add>, %142, %cst_40 [1] : vector<16x512xf32> to vector<16xf32>
    %144 = vector.shape_cast %143 : vector<16xf32> to vector<16x1xf32>
    %145 = tpu.concatenate %138, %144 in 1 : vector<16x1xf32>, vector<16x1xf32> -> vector<16x2xf32>
    %cst_41 = arith.constant 3.906250e-03 : f32
    %146 = vector.broadcast %cst_41 : f32 to vector<16x2xf32>
    %147 = arith.mulf %145, %146 : vector<16x2xf32>
    %cst_42 = arith.constant dense<0.000000e+00> : vector<8x2xf32>
    %148 = tpu.matmul %4, %147, %cst_42 {dimension_numbers = #tpu.dot_dimension_numbers<[1], [0], [0], [1], [0, 0, 1, 1], [], []>} : vector<8x16xf32>, vector<16x2xf32>, vector<8x2xf32> -> vector<8x2xf32>
    %149 = vector.broadcast %9 : vector<8x1xf32> to vector<8x2xf32>
    %150 = arith.addf %148, %149 : vector<8x2xf32>
    %cst_43 = arith.constant 0.000000e+00 : f32
    %151 = vector.broadcast %cst_43 : f32 to vector<8x2xf32>
    %152 = arith.maximumf %150, %151 : vector<8x2xf32>
    %cst_44 = arith.constant dense<0.000000e+00> : vector<16x2xf32>
    %153 = tpu.matmul %5, %152, %cst_44 {dimension_numbers = #tpu.dot_dimension_numbers<[1], [0], [0], [1], [0, 0, 1, 1], [], []>} : vector<16x8xf32>, vector<8x2xf32>, vector<16x2xf32> -> vector<16x2xf32>
    %154 = vector.broadcast %10 : vector<16x1xf32> to vector<16x2xf32>
    %155 = arith.addf %153, %154 : vector<16x2xf32>
    %cst_45 = arith.constant 3.000000e+00 : f32
    %156 = vector.broadcast %cst_45 : f32 to vector<16x2xf32>
    %157 = arith.addf %155, %156 : vector<16x2xf32>
    %cst_46 = arith.constant 0.000000e+00 : f32
    %cst_47 = arith.constant 6.000000e+00 : f32
    %158 = vector.broadcast %cst_46 : f32 to vector<16x2xf32>
    %159 = arith.maximumf %158, %157 : vector<16x2xf32>
    %160 = vector.broadcast %cst_47 : f32 to vector<16x2xf32>
    %161 = arith.minimumf %160, %159 : vector<16x2xf32>
    %cst_48 = arith.constant 0.166666672 : f32
    %162 = vector.broadcast %cst_48 : f32 to vector<16x2xf32>
    %163 = arith.mulf %161, %162 : vector<16x2xf32>
    %cst_49 = arith.constant 0.000000e+00 : f32
    %164 = vector.broadcast %cst_49 : f32 to vector<16x512xf32>
    %165 = vector.extract_strided_slice %163 {offsets = [0, 0], sizes = [16, 1], strides = [1, 1]} : vector<16x2xf32> to vector<16x1xf32>
    %166 = vector.shape_cast %127 : vector<1x512xi1> to vector<1x512xi1>
    %167 = vector.broadcast %166 : vector<1x512xi1> to vector<16x512xi1>
    %168 = vector.shape_cast %165 : vector<16x1xf32> to vector<16x1xf32>
    %169 = vector.broadcast %168 : vector<16x1xf32> to vector<16x512xf32>
    %170 = arith.select %167, %169, %164 : vector<16x512xi1>, vector<16x512xf32>
    %171 = vector.extract_strided_slice %163 {offsets = [0, 1], sizes = [16, 1], strides = [1, 1]} : vector<16x2xf32> to vector<16x1xf32>
    %172 = vector.shape_cast %132 : vector<1x512xi1> to vector<1x512xi1>
    %173 = vector.broadcast %172 : vector<1x512xi1> to vector<16x512xi1>
    %174 = vector.shape_cast %171 : vector<16x1xf32> to vector<16x1xf32>
    %175 = vector.broadcast %174 : vector<16x1xf32> to vector<16x512xf32>
    %176 = arith.select %173, %175, %170 : vector<16x512xi1>, vector<16x512xf32>
    %177 = arith.mulf %122, %176 : vector<16x512xf32>
    %cst_50 = arith.constant 3.000000e+00 : f32
    %178 = vector.broadcast %cst_50 : f32 to vector<16x512xf32>
    %179 = arith.addf %177, %178 : vector<16x512xf32>
    %cst_51 = arith.constant 0.000000e+00 : f32
    %cst_52 = arith.constant 6.000000e+00 : f32
    %180 = vector.broadcast %cst_51 : f32 to vector<16x512xf32>
    %181 = arith.maximumf %180, %179 : vector<16x512xf32>
    %182 = vector.broadcast %cst_52 : f32 to vector<16x512xf32>
    %183 = arith.minimumf %182, %181 : vector<16x512xf32>
    %cst_53 = arith.constant 0.166666672 : f32
    %184 = vector.broadcast %cst_53 : f32 to vector<16x512xf32>
    %185 = arith.mulf %183, %184 : vector<16x512xf32>
    %186 = arith.mulf %177, %185 : vector<16x512xf32>
    %cst_54 = arith.constant dense<0.000000e+00> : vector<8x512xf32>
    %187 = tpu.matmul %3, %186, %cst_54 {dimension_numbers = #tpu.dot_dimension_numbers<[1], [0], [0], [1], [0, 0, 1, 1], [], []>} : vector<8x16xf32>, vector<16x512xf32>, vector<8x512xf32> -> vector<8x512xf32>
    %188 = vector.broadcast %8 : vector<8x1xf32> to vector<8x512xf32>
    %189 = arith.addf %187, %188 : vector<8x512xf32>
    %190 = arith.addf %189, %0 : vector<8x512xf32>
    %c0_55 = arith.constant 0 : index
    %c0_56 = arith.constant 0 : index
    %191 = vector.load %arg3[%c0_55, %c0_56] : memref<8x512xf32, #tpu.memory_space<vmem>>, vector<8x512xf32>
    tpu.vector_store %arg3[%c0_55, %c0_56], %190 {strides = array<i32>} : memref<8x512xf32, #tpu.memory_space<vmem>>, vector<8x512xf32>,
    return
  }
  func.func @transform_0(%arg0: i32) -> (i32, i32) {
    %c0_i32 = arith.constant 0 : i32
    %c0_i32_0 = arith.constant 0 : i32
    %c0_i32_1 = arith.constant 0 : i32
    return %c0_i32, %c0_i32_0 : i32, i32
  }
  func.func @transform_1(%arg0: i32) -> (i32, i32) {
    %c0_i32 = arith.constant 0 : i32
    %c0_i32_0 = arith.constant 0 : i32
    %c0_i32_1 = arith.constant 0 : i32
    return %c0_i32, %c0_i32_0 : i32, i32
  }
  func.func @transform_2(%arg0: i32) -> (i32, i32) {
    %c0_i32 = arith.constant 0 : i32
    %c0_i32_0 = arith.constant 0 : i32
    %c0_i32_1 = arith.constant 0 : i32
    return %c0_i32, %c0_i32_0 : i32, i32
  }
}

</mosaic_0001>

<bundles_post_ra>
// kernel: tpu_custom_call.1
= control target key start
LH: loop header
LB: loop body
LE: loop exit
PB: predicated region body
PF: predicated region fallthrough
CT: control target
= control target key end

     0   :  { %7 = vsyncpa [#allocation3], 0  ;;  %s2338_s0 = inlined_call_operand.hbm [shape: f32[8,512], index: 0, kind: input, shape index: {}, may-alias: {0,2}]   ;;  %s2339_s1 = inlined_call_operand.vmem [shape: f32[16,128], index: 1, kind: input, shape index: {}]   ;;  %s2340_s2 = inlined_call_operand.hbm [shape: f32[8,512], index: 2, kind: output, shape index: {}, may-alias: {0,2}]  }
   0x1   :  { %8 = vsyncpa [#allocation4], 0  ;;  %s1454_s9 = smov [#allocation2]   ;;  %s1406_s13 = scalar_lea.hbm %s2338_s0, 512 }
   0x2   :  { %s15_s10 = sshll.u32 %s1454_s9, 4  ;;  %p1407_p0 = scmp.ne.s32.totalorder %s2338_s0, %s1406_s13  ;;  %s16_s10 = int_to_ptr.vmem [resolvable:$true] %s15_s10 }
   0x3   :  { %p1410_p1 = scmp.lt.u32.totalorder %s1406_s13, %s2338_s0 }
   0x5   :  { %p1412_p2 = pnand %p1410_p1, %p1407_p0 }
   0x7   :  { %1415 = shalt.err (!%p1412_p2)
}
   0x8   :  { %s1416_s18 = scalar_lea.vmem %s16_s10, 512  ;;  %p1421_p4 = scmp.lt.s32.totalorder %s16_s10, %s16_s10 }
   0x9   :  { %p1417_p3 = scmp.ne.s32.totalorder %s16_s10, %s1416_s18  ;;  %p1422_p5 = scmp.lt.s32.totalorder %s1416_s18, %s1416_s18 }
   0xb   :  { %p1423_p6 = por %p1422_p5, %p1421_p4 }
   0xd   :  { %p1424_p7 = pnand %p1423_p6, %p1417_p3 }
   0xf   :  { %1427 = shalt.err (!%p1424_p7)
}
  0x10   :  { %18 = dma.hbm_to_vmem [thread:$0]  %s2338_s0, 512, %s16_s10, [#allocation3]  }
  0x11   :  { %1450 = dma.done.wait [#allocation3], 512  }
  0x12   :  { %1451 = vsyncadd [#allocation3], 4294966784  ;;  %v2341_v0 = vmov 0.0   ;;  %v1456_v1 = vmov 8   ;;  %v1457_v2 = vmov 57   ;;  %v25_v3 = vld [vmem:[#allocation2 + $0x8] sm:$0xff] }
  0x13   :  { %123 = vmatprep.mubr.f32.mxu0 %v2341_v0  ;;  %200 = vmatprep.mubr.f32.mxu1 %v2341_v0  ;;  %v27_v4 = vld [vmem:[#allocation2 + $0x18] sm:$0xff]  ;;  %v24_v5 = vld [vmem:[#allocation2] sm:$0xff]  ;;  %vm2354_vm0 = vcmask 64512   ;;  %v26_v6 = vld [vmem:[#allocation2 + $0x10] sm:$0xff]  ;;  %v1458_v9 = vmov 9   ;;  %v1459_v10 = vmov 10  }
  0x14   :  { %1377 = vset.pattern.permute.xlu1 %v1456_v1  ;;  %1375 = vset.pattern.permute.xlu0 %v1457_v2  ;;  %v28_v7 = vld [vmem:[%s2339_s1] sm:$0xff]  ;;  %v29_v8 = vld [vmem:[%s2339_s1 + $0x8] sm:$0xff]  ;;  %v1460_v11 = vmov 11   ;;  %v1461_v12 = vmov 12   ;;  %v1462_v13 = vmov 13   ;;  %v1463_v14 = vmov 14  }
  0x15   :  { %59 = vmatprep.subr.mxu0 %v25_v3  ;;  %136 = vmatprep.subr.mxu1 %v27_v4  ;;  %v1464_v15 = vmov 15   ;;  %v1465_v16 = vmov 16   ;;  %v1466_v17 = vmov 58   ;;  %s1467_s24 = smov 16   ;;  %s1468_s25 = smov 112  }
  0x16   :  { %60 = vmatpush1.msra.mxu0 %v24_v5  ;;  %137 = vmatpush1.msra.mxu1 %v26_v6  ;;  %s1469_s26 = smov 1   ;;  %s1470_s27 = smov 127  }
  0x17   :  { %1309 = vmatmul.mubr.msk.f32.vlgmr.msra.gmra.mrb[0].mxu0 %vm2354_vm0, %v28_v7  ;;  %1311 = vmatmul.mubr.msk.f32.vlgmr.msra.gmra.mrb[0].mxu1 %vm2354_vm0, %v28_v7  ;;  %s1471_s30 = smov 95   ;;  %s1475_s5 = smov 79  }
  0x18   :  { %129 = vmatprep.mubr.f32.mxu0 %v2341_v0  ;;  %206 = vmatprep.mubr.f32.mxu1 %v2341_v0  ;;  %s1481_s8 = smov [#allocation5]  }
  0x19   :  { %393 = vperm.xlu1 %1377, %v29_v8   ;;  %46 = vperm.xlu0 %1375, %v28_v7   ;;  %s1300_s9 = sshll.u32 %s1481_s8, 4  ;;  %s1301_s9 = int_to_ptr.vmem [resolvable:$true] %s1300_s9 }
  0x1a   :  { %s1428_s10 = scalar_lea.vmem %s1301_s9, 512  ;;  %p1433_p9 = scmp.lt.s32.totalorder %s1301_s9, %s1301_s9 }
  0x1b   :  { %1310 = vmatmul.mubr.msk.f32.gmra.mrb[2].mxu0 %vm2354_vm0, %v29_v8  ;;  %1312 = vmatmul.mubr.msk.f32.gmra.mrb[2].mxu1 %vm2354_vm0, %v29_v8  ;;  %p1429_p8 = scmp.ne.s32.totalorder %s1301_s9, %s1428_s10  ;;  %p1434_p10 = scmp.lt.s32.totalorder %s1428_s10, %s1428_s10 }
  0x1d   :  { %1378 = vset.pattern.permute.xlu1 %v1458_v9  ;;  %51 = vperm.xlu0 %1375, %v29_v8   ;;  %p1435_p11 = por %p1434_p10, %p1433_p9 }
  0x1e   :  { %413 = vperm.xlu1 %1378, %v28_v7  }
  0x1f   :  { %p1436_p12 = pnand %p1435_p11, %p1429_p8 }
  0x21   :  { %1376 = vset.pattern.permute.xlu0 %v1456_v1 }
  0x22   :  { %1380 = vset.pattern.permute.xlu1 %v1459_v10  ;;  %389 = vperm.xlu0 %1376, %v28_v7  }
  0x23   :  { %482 = vperm.xlu1 %1380, %v28_v7  }
  0x26   :  { %1379 = vset.pattern.permute.xlu0 %v1458_v9 }
  0x27   :  { %486 = vperm.xlu1 %1380, %v29_v8   ;;  %417 = vperm.xlu0 %1379, %v29_v8  }
  0x2b   :  { %1382 = vset.pattern.permute.xlu1 %v1460_v11  ;;  %1381 = vset.pattern.permute.xlu0 %v1460_v11 }
  0x2c   :  { %542 = vperm.xlu1 %1382, %v29_v8   ;;  %538 = vperm.xlu0 %1381, %v28_v7  }
  0x30   :  { %1383 = vset.pattern.permute.xlu1 %v1461_v12  ;;  %1384 = vset.pattern.permute.xlu0 %v1461_v12 }
  0x31   :  { %562 = vperm.xlu1 %1383, %v28_v7   ;;  %566 = vperm.xlu0 %1384, %v29_v8  }
  0x35   :  { %1386 = vset.pattern.permute.xlu1 %v1462_v13  ;;  %1385 = vset.pattern.permute.xlu0 %v1462_v13 }
  0x36   :  { %622 = vperm.xlu1 %1386, %v29_v8   ;;  %618 = vperm.xlu0 %1385, %v28_v7  }
  0x3a   :  { %1387 = vset.pattern.permute.xlu1 %v1463_v14  ;;  %1388 = vset.pattern.permute.xlu0 %v1463_v14 }
  0x3b   :  { %674 = vperm.xlu1 %1387, %v28_v7   ;;  %678 = vperm.xlu0 %1388, %v29_v8  }
  0x3f   :  { %1389 = vset.pattern.permute.xlu1 %v1464_v15  ;;  %1390 = vset.pattern.permute.xlu0 %v1465_v16 }
  0x40   :  { %698 = vperm.xlu1 %1389, %v28_v7   ;;  %754 = vperm.xlu0 %1390, %v28_v7  }
  0x44   :  { %702 = vperm.xlu1 %1389, %v29_v8   ;;  %1393 = vset.pattern.permute.xlu0 %v1466_v17 }
  0x45   :  { %782 = vperm.xlu0 %1393, %v29_v8  }
  0x48   :  { %1391 = vset.pattern.permute.xlu1 %v1465_v16 }
  0x49   :  { %758 = vperm.xlu1 %1391, %v29_v8  }
  0x4d   :  { %1392 = vset.pattern.permute.xlu1 %v1466_v17 }
  0x4e   :  { %778 = vperm.xlu1 %1392, %v28_v7  }
  0x98   :  { %v47_v18 = vpop.permute.xlu0 %46  ;;  %v1585_v12 = vpop.permute.xlu1 %393 }
  0x9c   :  { %v52_v40 = vpop.permute.xlu0 %51 }
  0x9d   :  { %v1593_v14 = vpop.permute.xlu1 %413 }
  0xa1   :  { %v1611_v17 = vpop.permute.xlu0 %389 }
  0xa2   :  { %v1603_v15 = vpop.permute.xlu1 %482 }
  0xa6   :  { %v1607_v16 = vpop.permute.xlu1 %486 }
  0xa7   :  { %2364 = vst [vmem:[#allocation11_spill] sm:$0xff] %v1607_v16 }
  0xea   :  { %v125_v19 = vpop.f32.mrb[0].mxu0  ;;  %v202_v20 = vpop.f32.mrb[0].mxu1 }
  0xeb   :  { %v126_v21 = vadd.f32 %v125_v19, %v47_v18  ;;  %v203_v22 = vadd.f32 %v202_v20, %v47_v18  ;;  %v127_v23 = vpop.f32.mrb[1].mxu0  ;;  %v204_v24 = vpop.f32.mrb[1].mxu1 }
  0xec   :  { %v128_v27 = vadd.f32 %v127_v23, %v47_v18  ;;  %v205_v34 = vadd.f32 %v204_v24, %v47_v18  ;;  %v1613_v18 = vpop.permute.xlu1 %542  ;;  %v1615_v19 = vpop.permute.xlu0 %417 }
  0xed   :  { %v213_v25 = vadd.f32 3.0, %v126_v21  ;;  %v215_v26 = vadd.f32 3.0, %v203_v22  ;;  %2365 = vst [vmem:[#allocation12_spill] sm:$0xff] %v1613_v18 }
  0xee   :  { %v131_v28 = vpop.f32.mrb[2].mxu0  ;;  %v208_v29 = vpop.f32.mrb[2].mxu1  ;;  %v214_v37 = vadd.f32 3.0, %v128_v27  ;;  %v216_v41 = vadd.f32 3.0, %v205_v34 }
  0xef   :  { %v221_v30 = vmax.f32 %v213_v25, 0.0  ;;  %v223_v31 = vmax.f32 %v215_v26, 0.0  ;;  %v133_v32 = vpop.f32.mrb[3].mxu0  ;;  %v210_v33 = vpop.f32.mrb[3].mxu1  ;;  %v132_v45 = vadd.f32 %v131_v28, %v52_v40  ;;  %v209_v49 = vadd.f32 %v208_v29, %v52_v40 }
  0xf0   :  { %v222_v44 = vmax.f32 %v214_v37, 0.0  ;;  %v224_v47 = vmax.f32 %v216_v41, 0.0  ;;  %v134_v1 = vadd.f32 %v133_v32, %v52_v40  ;;  %v211_v3 = vadd.f32 %v210_v33, %v52_v40  ;;  %v1617_v20 = vpop.permute.xlu1 %562 }
  0xf1   :  { %v229_v35 = vmin.f32 %v221_v30, 6.0  ;;  %v231_v36 = vmin.f32 %v223_v31, 6.0  ;;  %v217_v48 = vadd.f32 3.0, %v132_v45  ;;  %v219_v53 = vadd.f32 3.0, %v209_v49 }
  0xf2   :  { %v230_v46 = vmin.f32 %v222_v44, 6.0  ;;  %v232_v51 = vmin.f32 %v224_v47, 6.0  ;;  %v218_v2 = vadd.f32 3.0, %v134_v1  ;;  %v220_v5 = vadd.f32 3.0, %v211_v3 }
  0xf3   :  { %v237_v38 = vmul.f32 0.16666667, %v229_v35  ;;  %v239_v39 = vmul.f32 0.16666667, %v231_v36  ;;  %v225_v52 = vmax.f32 %v217_v48, 0.0  ;;  %v227_v57 = vmax.f32 %v219_v53, 0.0 }
  0xf4   :  { %v238_v50 = vmul.f32 0.16666667, %v230_v46  ;;  %v240_v55 = vmul.f32 0.16666667, %v232_v51  ;;  %v226_v4 = vmax.f32 %v218_v2, 0.0  ;;  %v228_v7 = vmax.f32 %v220_v5, 0.0 }
  0xf5   :  { %v1523_v42 = vmul.f32 %v237_v38, %v126_v21  ;;  %v1525_v43 = vmul.f32 %v239_v39, %v203_v22  ;;  %v233_v56 = vmin.f32 %v225_v52, 6.0  ;;  %v235_v60 = vmin.f32 %v227_v57, 6.0  ;;  %v1619_v21 = vpop.permute.xlu0 %538  ;;  %v1621_v22 = vpop.permute.xlu1 %622 }
  0xf6   :  { %v1539_v54 = vmul.f32 %v238_v50, %v128_v27  ;;  %v1545_v58 = vmul.f32 %v240_v55, %v205_v34  ;;  %v234_v6 = vmin.f32 %v226_v4, 6.0  ;;  %v236_v9 = vmin.f32 %v228_v7, 6.0  ;;  %2366 = vst [vmem:[#allocation13_spill] sm:$0xff] %v1621_v22 }
  0xf7   :  { %261 = vrot.lane.b32.xlu0 %v1525_v43, %s1467_s24  ;;  %253 = vrot.lane.b32.xlu1 %v1523_v42, %s1467_s24  ;;  %v241_v59 = vmul.f32 0.16666667, %v233_v56  ;;  %v243_v62 = vmul.f32 0.16666667, %v235_v60  ;;  %v31_v31 = vlaneseq }
  0xf8   :  { %v242_v8 = vmul.f32 0.16666667, %v234_v6  ;;  %v244_v11 = vmul.f32 0.16666667, %v236_v9 }
  0xf9   :  { %v1551_v61 = vmul.f32 %v241_v59, %v132_v45  ;;  %v1557_v63 = vmul.f32 %v243_v62, %v209_v49  ;;  %v1623_v23 = vpop.permute.xlu0 %566  ;;  %v1625_v24 = vpop.permute.xlu1 %674  ;;  %v1643_v34 = vand.u32 127, %v31_v31 }
  0xfa   :  { %v1579_v10 = vmul.f32 %v242_v8, %v134_v1  ;;  %v1587_v13 = vmul.f32 %v244_v11, %v211_v3 }
  0xfb   :  { %298 = vrot.lane.b32.xlu0 %v1523_v42, %s1468_s25  ;;  %505 = vrot.lane.b32.xlu1 %v1523_v42, %s1469_s26  ;;  %2361 = vst [vmem:[#allocation8_spill] sm:$0xff] %v1557_v63  ;;  %v33_v35 = vadd.s32 128, %v1643_v34  ;;  %v34_v36 = vadd.s32 256, %v1643_v34  ;;  %v1650_v41 = vadd.s32 384, %v1643_v34  ;;  %v36_v48 = vand.u32 255, %v1643_v34 }
  0xfc   :  { %2362 = vst [vmem:[#allocation9_spill] sm:$0xff] %v1579_v10  ;;  %2363 = vst [vmem:[#allocation10_spill] sm:$0xff] %v1587_v13  ;;  %vm359_vm1 = vcmp.lt.s32.totalorder %v1643_v34, 1  ;;  %vm269_vm6 = vcmp.lt.s32.totalorder %v1643_v34, 16  ;;  %vm314_vm7 = vcmp.lt.s32.totalorder %v1643_v34, 112  ;;  %vm452_vm10 = vcmp.lt.s32.totalorder %v1643_v34, 127 }
  0xfd   :  { %v1627_v25 = vpop.permute.xlu0 %618  ;;  %v1629_v26 = vpop.permute.xlu1 %698  ;;  %v37_v39 = vand.u32 255, %v33_v35  ;;  %v38_v40 = vand.u32 255, %v34_v36  ;;  %v2343_v49 = vand.u32 255, %v1650_v41  ;;  %v1663_v52 = vand.u32 15, %v36_v48 }
  0xfe   :  { %vm1779_vm13 = vcmp.ge.s32.totalorder %v36_v48, 16 }
  0xff   :  { %306 = vrot.lane.b32.xlu0 %v1525_v43, %s1468_s25  ;;  %513 = vrot.lane.b32.xlu1 %v1525_v43, %s1469_s26  ;;  %v1654_v46 = vand.u32 15, %v37_v39  ;;  %v1656_v47 = vand.u32 15, %v38_v40  ;;  %v1667_v53 = vand.u32 15, %v2343_v49  ;;  %vm368_vm4 = vcmp.ge.s32.totalorder %v1663_v52, 1 }
 0x100   :  { %vm1720_vm8 = vcmp.ge.s32.totalorder %v38_v40, 16  ;;  %vm1741_vm9 = vcmp.lt.s32.totalorder %v37_v39, 240  ;;  %vm461_vm11 = vcmp.lt.s32.totalorder %v1663_v52, 15 }
 0x101   :  { %v1631_v27 = vpop.permute.xlu0 %678  ;;  %v1633_v28 = vpop.permute.xlu1 %702  ;;  %vm369_vm2 = vcmp.ge.s32.totalorder %v1654_v46, 1  ;;  %vm370_vm3 = vcmp.ge.s32.totalorder %v1656_v47, 1  ;;  %vm371_vm5 = vcmp.ge.s32.totalorder %v1667_v53, 1  ;;  %vm462_vm12 = vcmp.lt.s32.totalorder %v1654_v46, 15 }
 0x102   :  { %2367 = vst [vmem:[#allocation14_spill] sm:$0xff] %v1631_v27  ;;  %2368 = vst [vmem:[#allocation15_spill] sm:$0xff] %v1633_v28  ;;  %vm463_vm14 = vcmp.lt.s32.totalorder %v1656_v47, 15  ;;  %vm464_vm15 = vcmp.lt.s32.totalorder %v1667_v53, 15 }
 0x103   :  { %585 = vrot.lane.b32.xlu0 %v1523_v42, %s1470_s27  ;;  %509 = vrot.lane.b32.xlu1 %v1539_v54, %s1469_s26 }
 0x105   :  { %v1635_v29 = vpop.permute.xlu0 %754  ;;  %v1637_v30 = vpop.permute.xlu1 %758 }
 0x106   :  { %2369 = vst [vmem:[#allocation16_spill] sm:$0xff] %v1637_v30 }
 0x107   :  { %593 = vrot.lane.b32.xlu0 %v1525_v43, %s1470_s27  ;;  %517 = vrot.lane.b32.xlu1 %v1545_v58, %s1469_s26 }
 0x109   :  { %v1639_v32 = vpop.permute.xlu1 %778  ;;  %v1641_v33 = vpop.permute.xlu0 %782 }
 0x10a   :  { %2370 = vst [vmem:[#allocation17_spill] sm:$0xff] %v1639_v32  ;;  %2371 = vst [vmem:[#allocation18_spill] sm:$0xff] %v1641_v33 }
 0x10b   :  { %257 = vrot.lane.b32.xlu0 %v1539_v54, %s1467_s24  ;;  %255 = vrot.lane.b32.xlu1 %v1551_v61, %s1467_s24 }
 0x10f   :  { %265 = vrot.lane.b32.xlu0 %v1545_v58, %s1467_s24  ;;  %263 = vrot.lane.b32.xlu1 %v1557_v63, %s1467_s24 }
 0x113   :  { %302 = vrot.lane.b32.xlu0 %v1539_v54, %s1468_s25  ;;  %300 = vrot.lane.b32.xlu1 %v1551_v61, %s1468_s25 }
 0x117   :  { %310 = vrot.lane.b32.xlu0 %v1545_v58, %s1468_s25  ;;  %308 = vrot.lane.b32.xlu1 %v1557_v63, %s1468_s25 }
 0x11b   :  { %589 = vrot.lane.b32.xlu0 %v1539_v54, %s1470_s27  ;;  %587 = vrot.lane.b32.xlu1 %v1551_v61, %s1470_s27 }
 0x11f   :  { %597 = vrot.lane.b32.xlu0 %v1545_v58, %s1470_s27  ;;  %595 = vrot.lane.b32.xlu1 %v1557_v63, %s1470_s27 }
 0x123   :  { %507 = vrot.lane.b32.xlu0 %v1551_v61, %s1469_s26  ;;  %259 = vrot.lane.b32.xlu1 %v1579_v10, %s1467_s24 }
 0x127   :  { %515 = vrot.lane.b32.xlu0 %v1557_v63, %s1469_s26  ;;  %267 = vrot.lane.b32.xlu1 %v1587_v13, %s1467_s24 }
 0x12b   :  { %511 = vrot.lane.b32.xlu0 %v1579_v10, %s1469_s26  ;;  %304 = vrot.lane.b32.xlu1 %v1579_v10, %s1468_s25 }
 0x12f   :  { %519 = vrot.lane.b32.xlu0 %v1587_v13, %s1469_s26  ;;  %312 = vrot.lane.b32.xlu1 %v1587_v13, %s1468_s25 }
 0x133   :  { %591 = vrot.lane.b32.xlu1 %v1579_v10, %s1470_s27 }
 0x137   :  { %599 = vrot.lane.b32.xlu1 %v1587_v13, %s1470_s27 }
 0x169   :  { %v262_v37 = vpop.permute.xlu0 %261  ;;  %v1647_v38 = vpop.permute.xlu1 %253 }
 0x16d   :  { %v1652_v44 = vpop.permute.xlu0 %298  ;;  %v506_v45 = vpop.permute.xlu1 %505 }
 0x171   :  { %v307_v50 = vpop.permute.xlu0 %306  ;;  %v514_v51 = vpop.permute.xlu1 %513 }
 0x175   :  { %v586_v55 = vpop.permute.xlu0 %585  ;;  %v510_v56 = vpop.permute.xlu1 %509 }
 0x176   :  { %v523_v57 = vsel %vm359_vm1, %v510_v56, %v514_v51  ;;  %v525_v59 = vsel %vm359_vm1, %v506_v45, %v510_v56 }
 0x177   :  { %v1675_v60 = vsel %vm369_vm2, %v525_v59, 0.0  ;;  %v1679_v62 = vsel %vm370_vm3, %v523_v57, 0.0 }
 0x179   :  { %v594_v1 = vpop.permute.xlu0 %593  ;;  %v518_v2 = vpop.permute.xlu1 %517 }
 0x17a   :  { %v521_v3 = vsel %vm359_vm1, %v514_v51, %v518_v2  ;;  %v527_v4 = vsel %vm359_vm1, %v518_v2, %v506_v45 }
 0x17b   :  { %v1689_v5 = vsel %vm368_vm4, %v527_v4, 0.0  ;;  %v1693_v6 = vsel %vm371_vm5, %v521_v3, 0.0 }
 0x17d   :  { %v258_v7 = vpop.permute.xlu0 %257  ;;  %v1696_v8 = vpop.permute.xlu1 %255 }
 0x17e   :  { %v1701_v9 = vsel %vm269_vm6, %v1647_v38, %v258_v7  ;;  %v272_v36 = vsel %vm269_vm6, %v258_v7, %v262_v37 }
 0x17f   :  { %440 = vrot.lane.b32.xlu0 %v1701_v9, %s1470_s27  ;;  %347 = vrot.lane.b32.xlu1 %v1701_v9, %s1469_s26  ;;  %v1728_v57 = vsel %vm1720_vm8, %v272_v36, 0.0 }
 0x181   :  { %v266_v11 = vpop.permute.xlu0 %265  ;;  %v1707_v31 = vpop.permute.xlu1 %263 }
 0x182   :  { %v1711_v35 = vsel %vm269_vm6, %v262_v37, %v266_v11 }
 0x183   :  { %448 = vrot.lane.b32.xlu0 %v1711_v35, %s1470_s27  ;;  %355 = vrot.lane.b32.xlu1 %v1711_v35, %s1469_s26 }
 0x185   :  { %v303_v51 = vpop.permute.xlu0 %302  ;;  %v1724_v56 = vpop.permute.xlu1 %300 }
 0x186   :  { %v1733_v37 = vsel %vm314_vm7, %v1652_v44, %v303_v51  ;;  %v317_v59 = vsel %vm314_vm7, %v303_v51, %v307_v50 }
 0x187   :  { %444 = vrot.lane.b32.xlu0 %v1728_v57, %s1470_s27  ;;  %641 = vrot.lane.b32.xlu1 %v1733_v37, %s1469_s26  ;;  %v1749_v4 = vsel %vm1741_vm9, %v317_v59, 0.0  ;;  %v276_v59 = vsel %vm269_vm6, %v266_v11, %v1647_v38 }
 0x189   :  { %v311_v2 = vpop.permute.xlu0 %310  ;;  %v1745_v3 = vpop.permute.xlu1 %308 }
 0x18a   :  { %v1753_v7 = vsel %vm314_vm7, %v307_v50, %v311_v2  ;;  %v321_v18 = vsel %vm314_vm7, %v311_v2, %v1652_v44 }
 0x18b   :  { %725 = vrot.lane.b32.xlu0 %v1749_v4, %s1470_s27  ;;  %649 = vrot.lane.b32.xlu1 %v1753_v7, %s1469_s26 }
 0x18d   :  { %v590_v39 = vpop.permute.xlu0 %589  ;;  %v588_v36 = vpop.permute.xlu1 %587 }
 0x18e   :  { %v603_v51 = vsel %vm452_vm10, %v590_v39, %v594_v1  ;;  %v605_v50 = vsel %vm452_vm10, %v586_v55, %v590_v39 }
 0x18f   :  { %v1771_v0 = vsel %vm461_vm11, %v605_v50, 0.0  ;;  %v1775_v49 = vsel %vm462_vm12, %v603_v51, 0.0  ;;  %721 = vrot.lane.b32.xlu1 %v1733_v37, %s1470_s27  ;;  %v1791_v50 = vsel %vm1779_vm13, %v276_v59, 0.0 }
 0x191   :  { %v598_v38 = vpop.permute.xlu0 %597  ;;  %v596_v11 = vpop.permute.xlu1 %595 }
 0x192   :  { %v601_v39 = vsel %vm452_vm10, %v594_v1, %v598_v38  ;;  %v607_v51 = vsel %vm452_vm10, %v598_v38, %v586_v55 }
 0x193   :  { %v1795_v48 = vsel %vm463_vm14, %v601_v39, 0.0  ;;  %v1799_v30 = vsel %vm464_vm15, %v607_v51, 0.0  ;;  %343 = vrot.lane.b32.xlu1 %v1791_v50, %s1469_s26 }
 0x195   :  { %v508_v27 = vpop.permute.xlu0 %507  ;;  %v260_v1 = vpop.permute.xlu1 %259 }
 0x196   :  { %v1806_v55 = vsel %vm269_vm6, %v1696_v8, %v260_v1 }
 0x197   :  { %351 = vrot.lane.b32.xlu1 %v1728_v57, %s1469_s26  ;;  %349 = vrot.lane.b32.xlu0 %v1806_v55, %s1469_s26 }
 0x199   :  { %v516_v59 = vpop.permute.xlu0 %515  ;;  %v268_v38 = vpop.permute.xlu1 %267 }
 0x19a   :  { %v1815_v39 = vsel %vm269_vm6, %v1707_v31, %v268_v38 }
 0x19b   :  { %436 = vrot.lane.b32.xlu1 %v1791_v50, %s1470_s27  ;;  %357 = vrot.lane.b32.xlu0 %v1815_v39, %s1469_s26 }
 0x19d   :  { %v512_v51 = vpop.permute.xlu0 %511  ;;  %v305_v32 = vpop.permute.xlu1 %304 }
 0x19e   :  { %v524_v22 = vsel %vm359_vm1, %v512_v51, %v516_v59  ;;  %v526_v16 = vsel %vm359_vm1, %v508_v27, %v512_v51  ;;  %v1828_v28 = vsel %vm314_vm7, %v1724_v56, %v305_v32  ;;  %v2381_v51 = vand.u32 255, %v1650_v41 }
 0x19f   :  { %2378 = vst [vmem:[#allocation19_spill] sm:$0xff] %v1828_v28  ;;  %v1835_v13 = vsel %vm369_vm2, %v526_v16, 0.0  ;;  %v1839_v63 = vsel %vm370_vm3, %v524_v22, 0.0  ;;  %645 = vrot.lane.b32.xlu1 %v1749_v4, %s1469_s26  ;;  %643 = vrot.lane.b32.xlu0 %v1828_v28, %s1469_s26  ;;  %v318_v45 = vsel %vm314_vm7, %v305_v32, %v1745_v3 }
 0x1a0   :  { %2379 = vst [vmem:[#allocation20_spill] sm:$0xff] %v1835_v13  ;;  %2380 = vst [vmem:[#allocation21_spill] sm:$0xff] %v1839_v63  ;;  %vm1847_vm0 = vcmp.lt.s32.totalorder %v2381_v51, 240  ;;  %v277_v51 = vsel %vm269_vm6, %v268_v38, %v1696_v8 }
 0x1a1   :  { %v520_v44 = vpop.permute.xlu0 %519  ;;  %v313_v2 = vpop.permute.xlu1 %312  ;;  %v1857_v63 = vsel %vm1847_vm0, %v321_v18, 0.0  ;;  %v1885_v38 = vsel %vm1779_vm13, %v277_v51, 0.0 }
 0x1a2   :  { %v522_v16 = vsel %vm359_vm1, %v516_v59, %v520_v44  ;;  %v528_v22 = vsel %vm359_vm1, %v520_v44, %v508_v27  ;;  %v1862_v41 = vsel %vm314_vm7, %v1745_v3, %v313_v2  ;;  %v273_v44 = vsel %vm269_vm6, %v260_v1, %v1707_v31 }
 0x1a3   :  { %2384 = vst [vmem:[#allocation22_spill] sm:$0xff] %v1862_v41  ;;  %v1869_v13 = vsel %vm368_vm4, %v528_v22, 0.0  ;;  %v1873_v27 = vsel %vm371_vm5, %v522_v16, 0.0  ;;  %653 = vrot.lane.b32.xlu1 %v1857_v63, %s1469_s26  ;;  %651 = vrot.lane.b32.xlu0 %v1862_v41, %s1469_s26  ;;  %v1908_v1 = vsel %vm1720_vm8, %v273_v44, 0.0 }
 0x1a4   :  { %2385 = vst [vmem:[#allocation23_spill] sm:$0xff] %v1869_v13  ;;  %2386 = vst [vmem:[#allocation24_spill] sm:$0xff] %v1873_v27  ;;  %v569_v27 = vmul.f32 %v1617_v20, %v1523_v42  ;;  %v422_v42 = vmul.f32 %v1593_v14, %v1728_v57  ;;  %v572_v57 = vmul.f32 %v1617_v20, %v1545_v58 }
 0x1a5   :  { %v592_v18 = vpop.permute.xlu1 %591  ;;  %v626_v58 = vmul.f32 %v1627_v25, %v1775_v49  ;;  %v707_v49 = vmul.f32 %v1629_v26, %v1753_v7 }
 0x1a6   :  { %v604_v59 = vsel %vm452_vm10, %v592_v18, %v596_v11  ;;  %v606_v8 = vsel %vm452_vm10, %v588_v36, %v592_v18 }
 0x1a7   :  { %v1892_v16 = vsel %vm461_vm11, %v606_v8, 0.0  ;;  %v1896_v22 = vsel %vm462_vm12, %v604_v59, 0.0  ;;  %442 = vrot.lane.b32.xlu1 %v1806_v55, %s1470_s27  ;;  %345 = vrot.lane.b32.xlu0 %v1885_v38, %s1469_s26 }
 0x1a8   :  { %2387 = vst [vmem:[#allocation25_spill] sm:$0xff] %v1892_v16  ;;  %2388 = vst [vmem:[#allocation26_spill] sm:$0xff] %v1896_v22 }
 0x1a9   :  { %v600_v33 = vpop.permute.xlu1 %599 }
 0x1aa   :  { %v602_v51 = vsel %vm452_vm10, %v596_v11, %v600_v33  ;;  %v608_v31 = vsel %vm452_vm10, %v600_v33, %v588_v36  ;;  %v1931_v36 = vsel %vm1741_vm9, %v318_v45, 0.0  ;;  %v322_v11 = vsel %vm314_vm7, %v313_v2, %v1724_v56 }
 0x1ab   :  { %v1912_v18 = vsel %vm463_vm14, %v602_v51, 0.0  ;;  %v1916_v59 = vsel %vm464_vm15, %v608_v31, 0.0  ;;  %450 = vrot.lane.b32.xlu1 %v1815_v39, %s1470_s27  ;;  %353 = vrot.lane.b32.xlu0 %v1908_v1, %s1469_s26  ;;  %2391 = vst [vmem:[#allocation29_spill] sm:$0xff] %v1931_v36  ;;  %v1942_v32 = vsel %vm1847_vm0, %v322_v11, 0.0  ;;  %vm1473_vm0 = vmmov 0  }
 0x1ac   :  { %2389 = vst [vmem:[#allocation27_spill] sm:$0xff] %v1912_v18  ;;  %2390 = vst [vmem:[#allocation28_spill] sm:$0xff] %v1916_v59 }
 0x1ad   :  { %2392 = vst [vmem:[#allocation30_spill] sm:$0xff] %v1942_v32 }
 0x1af   :  { %723 = vrot.lane.b32.xlu1 %v1828_v28, %s1470_s27  ;;  %729 = vrot.lane.b32.xlu0 %v1753_v7, %s1470_s27  ;;  %v627_v7 = vmul.f32 %v1627_v25, %v1795_v48 }
 0x1b3   :  { %438 = vrot.lane.b32.xlu1 %v1885_v38, %s1470_s27  ;;  %647 = vrot.lane.b32.xlu0 %v1931_v36, %s1469_s26 }
 0x1b7   :  { %446 = vrot.lane.b32.xlu1 %v1908_v1, %s1470_s27  ;;  %655 = vrot.lane.b32.xlu0 %v1942_v32, %s1469_s26 }
 0x1bb   :  { %731 = vrot.lane.b32.xlu1 %v1862_v41, %s1470_s27  ;;  %733 = vrot.lane.b32.xlu0 %v1857_v63, %s1470_s27 }
 0x1bf   :  { %727 = vrot.lane.b32.xlu1 %v1931_v36, %s1470_s27 }
 0x1c3   :  { %735 = vrot.lane.b32.xlu1 %v1942_v32, %s1470_s27 }
 0x1f1   :  { %v441_v10 = vpop.permute.xlu0 %440  ;;  %v348_v56 = vpop.permute.xlu1 %347 }
 0x1f5   :  { %v449_v40 = vpop.permute.xlu0 %448  ;;  %v356_v3 = vpop.permute.xlu1 %355 }
 0x1f9   :  { %v445_v2 = vpop.permute.xlu0 %444  ;;  %v1956_v8 = vpop.permute.xlu1 %641 }
 0x1fa   :  { %v453_v44 = vsel %vm452_vm10, %v445_v2, %v449_v40  ;;  %v455_v33 = vsel %vm452_vm10, %v441_v10, %v445_v2 }
 0x1fb   :  { %v474_v51 = vsel %vm462_vm12, %v455_v33, 0.0  ;;  %v475_v31 = vsel %vm463_vm14, %v453_v44, 0.0 }
 0x1fd   :  { %v1966_v45 = vpop.permute.xlu1 %649  ;;  %v1968_v11 = vpop.permute.xlu0 %725 }
 0x201   :  { %v1970_v41 = vpop.permute.xlu1 %721 }
 0x202   :  { %2393 = vst [vmem:[#allocation31_spill] sm:$0xff] %v1970_v41  ;;  %v741_v36 = vsel %vm452_vm10, %v1970_v41, %v1968_v11  ;;  %v421_v41 = vmul.f32 %v1593_v14, %v1701_v9 }
 0x203   :  { %v1978_v2 = vsel %vm461_vm11, %v741_v36, 0.0  ;;  %v420_v36 = vmul.f32 %v1593_v14, %v1791_v50 }
 0x205   :  { %v344_v18 = vpop.permute.xlu1 %343 }
 0x206   :  { %v364_v33 = vsel %vm359_vm1, %v344_v18, %v348_v56  ;;  %v366_v44 = vsel %vm359_vm1, %v356_v3, %v344_v18  ;;  %v571_v18 = vmul.f32 %v1617_v20, %v1525_v43 }
 0x207   :  { %v380_v22 = vsel %vm368_vm4, %v366_v44, 0.0  ;;  %v381_v59 = vsel %vm369_vm2, %v364_v33, 0.0  ;;  %v490_v44 = vmul.f32 %v1603_v15, %v474_v51 }
 0x208   :  { %v396_v32 = vmul.f32 %v1611_v17, %v380_v22  ;;  %v397_v16 = vmul.f32 %v1611_v17, %v381_v59  ;;  %v546_v59 = vmul.f32 %v1619_v21, %v1675_v60  ;;  %v570_v60 = vmul.f32 %v1617_v20, %v1539_v54 }
 0x209   :  { %v1999_v13 = vpop.permute.xlu0 %349  ;;  %v352_v33 = vpop.permute.xlu1 %351  ;;  %v545_v54 = vmul.f32 %v1619_v21, %v1689_v5  ;;  %v706_v5 = vmul.f32 %v1629_v26, %v1749_v4 }
 0x20a   :  { %v428_v28 = vadd.f32 %v420_v36, %v396_v32  ;;  %v429_v9 = vadd.f32 %v421_v41, %v397_v16  ;;  %v360_v50 = vsel %vm359_vm1, %v352_v33, %v356_v3  ;;  %v362_v22 = vsel %vm359_vm1, %v348_v56, %v352_v33 }
 0x20b   :  { %v382_v43 = vsel %vm370_vm3, %v362_v22, 0.0  ;;  %v383_v51 = vsel %vm371_vm5, %v360_v50, 0.0  ;;  %v423_v41 = vmul.f32 %v1593_v14, %v1711_v35  ;;  %v547_v3 = vmul.f32 %v1619_v21, %v1679_v62 }
 0x20c   :  { %v498_v16 = vadd.f32 %v490_v44, %v429_v9  ;;  %v398_v32 = vmul.f32 %v1611_v17, %v382_v43  ;;  %v399_v56 = vmul.f32 %v1611_v17, %v383_v51  ;;  %v491_v36 = vmul.f32 %v1603_v15, %v475_v31 }
 0x20d   :  { %v2024_v33 = vpop.permute.xlu0 %357  ;;  %v437_v50 = vpop.permute.xlu1 %436 }
 0x20e   :  { %v554_v14 = vadd.f32 %v546_v59, %v498_v16  ;;  %v430_v35 = vadd.f32 %v422_v42, %v398_v32  ;;  %v431_v44 = vadd.f32 %v423_v41, %v399_v56  ;;  %v457_v17 = vsel %vm452_vm10, %v437_v50, %v441_v10 }
 0x20f   :  { %v459_v20 = vsel %vm452_vm10, %v449_v40, %v437_v50  ;;  %v473_v62 = vsel %vm461_vm11, %v457_v17, 0.0  ;;  %v548_v10 = vmul.f32 %v1619_v21, %v1693_v6  ;;  %v625_v21 = vmul.f32 %v1627_v25, %v1771_v0 }
 0x210   :  { %v499_v31 = vadd.f32 %v491_v36, %v430_v35  ;;  %v476_v9 = vsel %vm464_vm15, %v459_v20, 0.0  ;;  %v489_v22 = vmul.f32 %v1603_v15, %v473_v62  ;;  %v578_v59 = vadd.f32 %v570_v60, %v554_v14 }
 0x211   :  { %v492_v40 = vmul.f32 %v1603_v15, %v476_v9  ;;  %v2046_v42 = vpop.permute.xlu0 %643  ;;  %v646_v43 = vpop.permute.xlu1 %645 }
 0x212   :  { %v555_v51 = vadd.f32 %v547_v3, %v499_v31  ;;  %v497_v41 = vadd.f32 %v489_v22, %v428_v28  ;;  %v634_v16 = vadd.f32 %v626_v58, %v578_v59  ;;  %v659_v32 = vsel %vm359_vm1, %v646_v43, %v1966_v45 }
 0x213   :  { %v500_v6 = vadd.f32 %v492_v40, %v431_v44  ;;  %v661_v4 = vsel %vm359_vm1, %v1956_v8, %v646_v43  ;;  %v667_v15 = vsel %vm370_vm3, %v659_v32, 0.0  ;;  %v628_v3 = vmul.f32 %v1627_v25, %v1799_v30 }
 0x214   :  { %v553_v28 = vadd.f32 %v545_v54, %v497_v41  ;;  %v579_v56 = vadd.f32 %v571_v18, %v555_v51  ;;  %v666_v60 = vsel %vm369_vm2, %v661_v4, 0.0  ;;  %v683_v50 = vmul.f32 %v1625_v24, %v667_v15 }
 0x215   :  { %v556_v0 = vadd.f32 %v548_v10, %v500_v6  ;;  %v682_v36 = vmul.f32 %v1625_v24, %v666_v60  ;;  %v2066_v14 = vpop.permute.xlu0 %651  ;;  %v654_v35 = vpop.permute.xlu1 %653  ;;  %v424_v51 = vmul.f32 %v1615_v19, %v1885_v38  ;;  %v427_v60 = vmul.f32 %v1615_v19, %v1815_v39 }
 0x216   :  { %v635_v44 = vadd.f32 %v627_v7, %v579_v56  ;;  %v577_v17 = vadd.f32 %v569_v27, %v553_v28  ;;  %v657_v48 = vsel %vm359_vm1, %v1966_v45, %v654_v35  ;;  %v663_v18 = vsel %vm359_vm1, %v654_v35, %v1956_v8 }
 0x217   :  { %v690_v54 = vadd.f32 %v682_v36, %v634_v16  ;;  %v580_v25 = vadd.f32 %v572_v57, %v556_v0  ;;  %v665_v30 = vsel %vm368_vm4, %v663_v18, 0.0  ;;  %v668_v58 = vsel %vm371_vm5, %v657_v48, 0.0  ;;  %v2396_v18 = vld [vmem:[#allocation10_spill] sm:$0xff] }
 0x218   :  { %v691_v20 = vadd.f32 %v683_v50, %v635_v44  ;;  %v633_v62 = vadd.f32 %v625_v21, %v577_v17  ;;  %v681_v27 = vmul.f32 %v1625_v24, %v665_v30  ;;  %v684_v31 = vmul.f32 %v1625_v24, %v668_v58  ;;  %v2398_v30 = vld [vmem:[#allocation12_spill] sm:$0xff]  ;;  %v2399_v58 = vld [vmem:[#allocation19_spill] sm:$0xff] }
 0x219   :  { %v705_v45 = vmul.f32 %v1629_v26, %v1733_v37  ;;  %v708_v8 = vmul.f32 %v1629_v26, %v1857_v63  ;;  %v636_v9 = vadd.f32 %v628_v3, %v580_v25  ;;  %v346_v57 = vpop.permute.xlu0 %345  ;;  %v2084_v22 = vpop.permute.xlu1 %442  ;;  %v714_v59 = vadd.f32 %v706_v5, %v690_v54  ;;  %v2397_v25 = vld [vmem:[#allocation20_spill] sm:$0xff] }
 0x21a   :  { %v689_v10 = vadd.f32 %v681_v27, %v633_v62  ;;  %v365_v40 = vsel %vm359_vm1, %v346_v57, %v1999_v13  ;;  %v367_v24 = vsel %vm359_vm1, %v2024_v33, %v346_v57  ;;  %v2092_v43 = vadd.f32 %v707_v49, %v691_v20  ;;  %v2400_v20 = vld [vmem:[#allocation15_spill] sm:$0xff] }
 0x21b   :  { %v425_v37 = vmul.f32 %v1615_v19, %v1806_v55  ;;  %v692_v63 = vadd.f32 %v684_v31, %v636_v9  ;;  %v384_v26 = vsel %vm368_vm4, %v367_v24, 0.0  ;;  %v385_v5 = vsel %vm369_vm2, %v365_v40, 0.0 }
 0x21c   :  { %v400_v41 = vmul.f32 %v1585_v12, %v384_v26  ;;  %v401_v16 = vmul.f32 %v1585_v12, %v385_v5  ;;  %v713_v32 = vadd.f32 %v705_v45, %v689_v10  ;;  %v761_v49 = vmul.f32 %v1635_v29, %v1978_v2  ;;  %v2402_v26 = vld [vmem:[#allocation23_spill] sm:$0xff] }
 0x21d   :  { %v354_v21 = vpop.permute.xlu0 %353  ;;  %v451_v55 = vpop.permute.xlu1 %450  ;;  %v2106_v6 = vadd.f32 %v708_v8, %v692_v63  ;;  %v426_v3 = vmul.f32 %v1615_v19, %v1908_v1  ;;  %v573_v39 = vmul.f32 %v1623_v23, %v1551_v61  ;;  %v2394_v19 = vld [vmem:[#allocation9_spill] sm:$0xff]  ;;  %v576_v54 = vmul.f32 %v1623_v23, %v2396_v18 }
 0x21e   :  { %v432_v4 = vadd.f32 %v424_v51, %v400_v41  ;;  %v2108_v15 = vadd.f32 %v425_v37, %v401_v16  ;;  %v361_v7 = vsel %vm359_vm1, %v354_v21, %v2024_v33  ;;  %v363_v38 = vsel %vm359_vm1, %v1999_v13, %v354_v21  ;;  %v2401_v37 = vld [vmem:[#allocation21_spill] sm:$0xff]  ;;  %v2403_v51 = vld [vmem:[#allocation11_spill] sm:$0xff] }
 0x21f   :  { %v386_v28 = vsel %vm370_vm3, %v363_v38, 0.0  ;;  %v387_v2 = vsel %vm371_vm5, %v361_v7, 0.0  ;;  %v769_v56 = vadd.f32 %v761_v49, %v713_v32  ;;  %v2137_v1 = vmul.f32 %v1623_v23, %v2394_v19  ;;  %v2404_v32 = vld [vmem:[#allocation24_spill] sm:$0xff]  ;;  %v2405_v21 = vld [vmem:[#allocation25_spill] sm:$0xff] }
 0x220   :  { %v402_v0 = vmul.f32 %v1585_v12, %v386_v28  ;;  %v403_v33 = vmul.f32 %v1585_v12, %v387_v2  ;;  %v2395_v12 = vld [vmem:[#allocation8_spill] sm:$0xff]  ;;  %v2149_v62 = vmul.f32 %v2400_v20, %v2399_v58  ;;  %v551_v63 = vmul.f32 %v2398_v30, %v2401_v37  ;;  %v2406_v7 = vld [vmem:[#allocation13_spill] sm:$0xff]  ;;  %v2407_v28 = vld [vmem:[#allocation30_spill] sm:$0xff] }
 0x221   :  { %v730_v36 = vpop.permute.xlu0 %729  ;;  %v2126_v50 = vpop.permute.xlu1 %723  ;;  %v2141_v48 = vmul.f32 %v1623_v23, %v2395_v12  ;;  %v549_v5 = vmul.f32 %v2398_v30, %v2402_v26  ;;  %v552_v49 = vmul.f32 %v2398_v30, %v2404_v32  ;;  %v629_v38 = vmul.f32 %v2406_v7, %v2405_v21  ;;  %v2409_v58 = vld [vmem:[#allocation17_spill] sm:$0xff]  ;;  %v2413_v21 = vld [vmem:[#allocation27_spill] sm:$0xff] }
 0x222   :  { %v434_v13 = vadd.f32 %v426_v3, %v402_v0  ;;  %v435_v35 = vadd.f32 %v427_v60, %v403_v33  ;;  %v739_v44 = vsel %vm452_vm10, %v1968_v11, %v730_v36  ;;  %v550_v11 = vmul.f32 %v2398_v30, %v2397_v25 }
 0x223   :  { %v746_v17 = vsel %vm462_vm12, %v739_v44, 0.0  ;;  %v2185_v2 = vmul.f32 %v2400_v20, %v2407_v28  ;;  %v631_v28 = vmul.f32 %v2406_v7, %v2413_v21  ;;  %v1401_v21 = vld [vmem:[%s2339_s1 + $0x8] sm:$0xff] }
 0x224   :  { %v762_v61 = vmul.f32 %v1635_v29, %v746_v17 }
 0x225   :  { %v648_v27 = vpop.permute.xlu0 %647  ;;  %v439_v31 = vpop.permute.xlu1 %438 }
 0x226   :  { %v660_v45 = vsel %vm359_vm1, %v648_v27, %v2066_v14  ;;  %v662_v8 = vsel %vm359_vm1, %v2046_v42, %v648_v27  ;;  %v458_v23 = vsel %vm452_vm10, %v439_v31, %v2084_v22  ;;  %v460_v9 = vsel %vm452_vm10, %v451_v55, %v439_v31 }
 0x227   :  { %v670_v57 = vsel %vm369_vm2, %v662_v8, 0.0  ;;  %v2167_v10 = vsel %vm370_vm3, %v660_v45, 0.0  ;;  %v477_v40 = vsel %vm461_vm11, %v458_v23, 0.0  ;;  %v480_v24 = vsel %vm464_vm15, %v460_v9, 0.0 }
 0x228   :  { %v493_v41 = vmul.f32 %v2403_v51, %v477_v40  ;;  %v496_v16 = vmul.f32 %v2403_v51, %v480_v24  ;;  %v770_v0 = vadd.f32 %v762_v61, %v714_v59  ;;  %v2410_v61 = vld [vmem:[#allocation14_spill] sm:$0xff]  ;;  %vm881_vm2 = vcmask 130048  }
 0x229   :  { %v656_v60 = vpop.permute.xlu0 %655  ;;  %v447_v3 = vpop.permute.xlu1 %446  ;;  %v687_v47 = vmul.f32 %v2410_v61, %v2167_v10  ;;  %v2417_v10 = vld [vmem:[#allocation18_spill] sm:$0xff]  ;;  %vm2419_vm3 = vcmask 64512  }
 0x22a   :  { %v501_v33 = vadd.f32 %v493_v41, %v432_v4  ;;  %v504_v44 = vadd.f32 %v496_v16, %v435_v35  ;;  %v658_v17 = vsel %vm359_vm1, %v2066_v14, %v656_v60  ;;  %v664_v19 = vsel %vm359_vm1, %v656_v60, %v2046_v42  ;;  %v2408_v4 = vld [vmem:[#allocation28_spill] sm:$0xff] }
 0x22b   :  { %v669_v12 = vsel %vm368_vm4, %v664_v19, 0.0  ;;  %v672_v18 = vsel %vm371_vm5, %v658_v17, 0.0  ;;  %v454_v25 = vsel %vm452_vm10, %v447_v3, %v451_v55  ;;  %v456_v59 = vsel %vm452_vm10, %v2084_v22, %v447_v3  ;;  %vm2420_vm4 = vmmov %vm2419_vm3 }
 0x22c   :  { %v632_v14 = vmul.f32 %v2406_v7, %v2408_v4  ;;  %v557_v35 = vadd.f32 %v549_v5, %v501_v33  ;;  %v560_v30 = vadd.f32 %v552_v49, %v504_v44  ;;  %v2205_v42 = vadd.f32 %v2409_v58, %v769_v56  ;;  %v2411_v5 = vld [vmem:[#allocation31_spill] sm:$0xff]  ;;  %v2412_v49 = vld [vmem:[#allocation26_spill] sm:$0xff] }
 0x22d   :  { %v685_v27 = vmul.f32 %v2410_v61, %v669_v12  ;;  %v478_v31 = vsel %vm462_vm12, %v456_v59, 0.0  ;;  %v479_v55 = vsel %vm463_vm14, %v454_v25, 0.0  ;;  %v2213_v45 = vadd.f32 %v2409_v58, %v770_v0  ;;  %v734_v22 = vpop.permute.xlu0 %733  ;;  %v732_v8 = vpop.permute.xlu1 %731 }
 0x22e   :  { %v581_v23 = vadd.f32 %v573_v39, %v557_v35  ;;  %v584_v9 = vadd.f32 %v576_v54, %v560_v30  ;;  %v494_v40 = vmul.f32 %v2403_v51, %v478_v31  ;;  %v495_v56 = vmul.f32 %v2403_v51, %v479_v55  ;;  %v2415_v30 = vld [vmem:[#allocation29_spill] sm:$0xff] }
 0x22f   :  { %v688_v24 = vmul.f32 %v2410_v61, %v672_v18  ;;  %v833_v37 = vadd.f32 %v2213_v45, %v2205_v42  ;;  %v737_v26 = vsel %vm452_vm10, %v730_v36, %v734_v22  ;;  %v743_v41 = vsel %vm452_vm10, %v734_v22, %v2411_v5 }
 0x230   :  { %v637_v16 = vadd.f32 %v629_v38, %v581_v23  ;;  %v640_v32 = vadd.f32 %v632_v14, %v584_v9  ;;  %v502_v39 = vadd.f32 %v494_v40, %v2108_v15  ;;  %v503_v54 = vadd.f32 %v495_v56, %v434_v13 }
 0x231   :  { %v630_v51 = vmul.f32 %v2406_v7, %v2412_v49  ;;  %836 = vadd.xlane.f32.xlu0 %v833_v37  ;;  %v747_v60 = vsel %vm463_vm14, %v737_v26, 0.0  ;;  %v748_v36 = vsel %vm464_vm15, %v743_v41, 0.0  ;;  %v728_v3 = vpop.permute.xlu1 %727  ;;  %v1474_v49 = vmov 60  }
 0x232   :  { %v693_v0 = vadd.f32 %v685_v27, %v637_v16  ;;  %v696_v38 = vadd.f32 %v688_v24, %v640_v32  ;;  %v558_v33 = vadd.f32 %v550_v11, %v502_v39  ;;  %v559_v44 = vadd.f32 %v551_v63, %v503_v54  ;;  %v2298_v32 = vld [vmem:[%s2339_s1] sm:$0xff]  ;;  %1394 = vset.pattern.permute.xlu0 %v1474_v49 }
 0x233   :  { %v763_v15 = vmul.f32 %v1635_v29, %v747_v60  ;;  %v764_v13 = vmul.f32 %v1635_v29, %v748_v36  ;;  %v740_v17 = vsel %vm452_vm10, %v728_v3, %v732_v8  ;;  %v742_v7 = vsel %vm452_vm10, %v2126_v50, %v728_v3  ;;  %v2414_v29 = vld [vmem:[#allocation16_spill] sm:$0xff] }
 0x234   :  { %v582_v19 = vadd.f32 %v2137_v1, %v558_v33  ;;  %v583_v12 = vadd.f32 %v2141_v48, %v559_v44  ;;  %v749_v18 = vsel %vm461_vm11, %v742_v7, 0.0  ;;  %v750_v11 = vsel %vm462_vm12, %v740_v17, 0.0 }
 0x235   :  { %v686_v63 = vmul.f32 %v2410_v61, %v670_v57  ;;  %v765_v25 = vmul.f32 %v2414_v29, %v749_v18  ;;  %v736_v59 = vpop.permute.xlu1 %735  ;;  %v771_v4 = vadd.f32 %v763_v15, %v2092_v43  ;;  %v772_v14 = vadd.f32 %v764_v13, %v2106_v6 }
 0x236   :  { %v738_v1 = vsel %vm452_vm10, %v732_v8, %v736_v59  ;;  %v744_v52 = vsel %vm452_vm10, %v736_v59, %v2126_v50  ;;  %v638_v48 = vadd.f32 %v630_v51, %v582_v19  ;;  %v717_v46 = vadd.f32 %v2149_v62, %v693_v0  ;;  %v2416_v8 = vld [vmem:[#allocation22_spill] sm:$0xff]  ;;  %v1400_v51 = vld [vmem:[%s2339_s1] sm:$0xff]  ;;  %s1478_s1 = smov 111  }
 0x237   :  { %v751_v57 = vsel %vm463_vm14, %v738_v1, 0.0  ;;  %v752_v35 = vsel %vm464_vm15, %v744_v52, 0.0  ;;  %v2262_v43 = vadd.f32 %v2409_v58, %v771_v4  ;;  %v2265_v6 = vadd.f32 %v2409_v58, %v772_v14 }
 0x238   :  { %v710_v27 = vmul.f32 %v2400_v20, %v2415_v30  ;;  %v768_v34 = vmul.f32 %v2414_v29, %v752_v35  ;;  %v694_v50 = vadd.f32 %v686_v63, %v638_v48  ;;  %v773_v31 = vadd.f32 %v765_v25, %v717_v46 }
 0x239   :  { %v861_v53 = vadd.f32 %v2265_v6, %v2262_v43  ;;  %v639_v62 = vadd.f32 %v631_v28, %v583_v12  ;;  %v720_v55 = vadd.f32 %v2185_v2, %v696_v38  ;;  %v766_v22 = vmul.f32 %v2414_v29, %v750_v11 }
 0x23a   :  { %v718_v58 = vadd.f32 %v710_v27, %v694_v50  ;;  %v711_v23 = vmul.f32 %v2400_v20, %v2416_v8  ;;  %v767_v9 = vmul.f32 %v2414_v29, %v751_v57  ;;  %v2280_v61 = vadd.f32 %v2417_v10, %v773_v31 }
 0x23b   :  { %862 = vadd.xlane.f32.xlu0 %v861_v53  ;;  %v695_v40 = vadd.f32 %v687_v47, %v639_v62  ;;  %v776_v56 = vadd.f32 %v768_v34, %v720_v55  ;;  %v1472_v39 = vmov 0.0|0.0   ;;  %v2418_v54 = vmov 0.0  }
 0x23c   :  { %v774_v24 = vadd.f32 %v766_v22, %v718_v58  ;;  %1336 = vmatprep.subr.bf16.mxu0 %v1472_v39  ;;  %1328 = vmatprep.mubr.msk.f32.mxu0 %vm1473_vm0, %v2418_v54  ;;  %vm869_vm1 = vcmask 7168   ;;  %v1476_v7 = vmov 61   ;;  %v1477_v25 = vmov 0  }
 0x23d   :  { %v719_v37 = vadd.f32 %v711_v23, %v695_v40  ;;  %v2286_v5 = vadd.f32 %v2417_v10, %v776_v56  ;;  %1395 = vset.pattern.permute.xlu1 %v1476_v7  ;;  %v1479_v47 = vmov 1   ;;  %v1480_v53 = vmov 59  }
 0x23e   :  { %v2283_v26 = vadd.f32 %v2417_v10, %v774_v24 }
 0x23f   :  { %v775_v2 = vadd.f32 %v767_v9, %v719_v37 }
 0x240   :  { %v838_v20 = vadd.f32 %v2283_v26, %v2280_v61 }
 0x241   :  { %v2291_v41 = vadd.f32 %v2417_v10, %v775_v2 }
 0x242   :  { %841 = vadd.xlane.f32.xlu1 %v838_v20 }
 0x243   :  { %v866_v16 = vadd.f32 %v2286_v5, %v2291_v41 }
 0x245   :  { %867 = vadd.xlane.f32.xlu0 %v866_v16 }
 0x253   :  { %879 = vrot.lane.b32.xlu1 %v2298_v32, %s1471_s30 }
 0x257   :  { %963 = vrot.lane.b32.xlu1 %v1400_v51, %s1475_s5 }
 0x25b   :  { %876 = vperm.xlu0 %1394, %v2298_v32   ;;  %965 = vrot.lane.b32.xlu1 %v1401_v21, %s1475_s5 }
 0x25f   :  { %956 = vperm.xlu1 %1395, %v1400_v51   ;;  %1140 = vrot.lane.b32.xlu0 %v2298_v32, %s1478_s1 }
 0x260   :  { %1399 = vset.pattern.permute.xlu0 %v1480_v53 }
 0x263   :  { %960 = vperm.xlu1 %1395, %v1401_v21  }
 0x267   :  { %1396 = vset.pattern.permute.xlu1 %v1477_v25 }
 0x2be   :  { %v837_v28 = vpop.xlane.xlu0 %836 }
 0x2c8   :  { %v863_v60 = vpop.xlane.xlu0 %862 }
 0x2c9   :  { %v870_v3 = vsel %vm869_vm1, %v837_v28, %v863_v60 }
 0x2ca   :  { %v872_v33 = vmul.f32 0.00390625, %v870_v3 }
 0x2cf   :  { %v842_v36 = vpop.xlane.xlu1 %841 }
 0x2d2   :  { %v868_v0 = vpop.xlane.xlu0 %867 }
 0x2d3   :  { %v871_v38 = vsel %vm869_vm1, %v842_v36, %v868_v0  ;;  %v880_v13 = vpop.permute.xlu1 %879 }
 0x2d4   :  { %v873_v44 = vmul.f32 0.00390625, %v871_v38 }
 0x2d6   :  { %v1337_v15 = vpack.c.bf16 %v873_v44, %v872_v33 }
 0x2d7   :  { %v964_v17 = vpop.permute.xlu1 %963 }
 0x2d8   :  { %1338 = vmatpush3.bf16.msra.mxu0 %v1337_v15  ;;  %1333 = vmatprep.mubr.msk.f32.mxu1 %vm2419_vm3, %v964_v17 }
 0x2da   :  { %v877_v19 = vpop.permute.xlu0 %876 }
 0x2db   :  { %1329 = vmatmul.mubr.msk.f32.vlgmr.msra.gmra.mrb[4].mxu0 %vm881_vm2, %v880_v13  ;;  %v966_v29 = vpop.permute.xlu1 %965 }
 0x2dc   :  { %1208 = vmatprep.mubr.f32.mxu0 %v2418_v54 }
 0x2df   :  { %v957_v59 = vpop.permute.xlu1 %956 }
 0x2e3   :  { %v961_v4 = vpop.permute.xlu1 %960 }
 0x3ae   :  { %v950_v12 = vpop.f32.mrb[4].mxu0 }
 0x3af   :  { %v951_v18 = vadd.f32 %v950_v12, %v877_v19  ;;  %v1330_v11 = vpop.f32.mrb[5].mxu0 }
 0x3b1   :  { %v954_v63 = vmax.f32 %v951_v18, 0.0 }
 0x3b3   :  { %1331 = vmatprep.subr.mxu1 %v954_v63 }
 0x3b4   :  { %1332 = vmatpush3.msra.mxu1 %v954_v63 }
 0x3b5   :  { %1334 = vmatmul.mubr.msk.f32.vlgmr.msra.gmra.mrb[4].mxu1 %vm2420_vm4, %v966_v29 }
 0x3b6   :  { %1279 = vmatprep.mubr.f32.mxu1 %v2418_v54 }
 0x488   :  { %v1335_v14 = vpop.f32.mrb[4].mxu1 }
 0x489   :  { %v1043_v1 = vadd.f32 %v1335_v14, %v961_v4  ;;  %v1037_v52 = vpop.f32.mrb[5].mxu1 }
 0x48a   :  { %v1038_v48 = vadd.f32 %v1037_v52, %v957_v59 }
 0x48b   :  { %v1047_v46 = vadd.f32 3.0, %v1043_v1 }
 0x48c   :  { %v1046_v57 = vadd.f32 3.0, %v1038_v48 }
 0x48d   :  { %v1049_v35 = vmax.f32 %v1047_v46, 0.0 }
 0x48e   :  { %v1048_v30 = vmax.f32 %v1046_v57, 0.0 }
 0x48f   :  { %v1051_v27 = vmin.f32 %v1049_v35, 6.0 }
 0x490   :  { %v1050_v50 = vmin.f32 %v1048_v30, 6.0 }
 0x491   :  { %v1053_v34 = vmul.f32 0.16666667, %v1051_v27 }
 0x492   :  { %v1052_v31 = vmul.f32 0.16666667, %v1050_v50 }
 0x493   :  { %1061 = vperm.xlu1 %1396, %v1053_v34  }
 0x497   :  { %1056 = vperm.xlu1 %1396, %v1052_v31  }
 0x49b   :  { %1397 = vset.pattern.permute.xlu1 %v1479_v47  ;;  %v1402_v47 = vld [vmem:[#allocation2] sm:$0xff] }
 0x49c   :  { %1073 = vperm.xlu1 %1397, %v1052_v31  }
 0x4a0   :  { %1077 = vperm.xlu1 %1397, %v1053_v34  }
 0x4a4   :  { %1398 = vset.pattern.permute.xlu1 %v1480_v53 }
 0x4a5   :  { %1137 = vperm.xlu1 %1398, %v2298_v32  }
 0x512   :  { %v1062_v62 = vpop.permute.xlu1 %1061 }
 0x513   :  { %v1092_v55 = vmul.f32 %v1062_v62, %v2280_v61  ;;  %v1093_v22 = vmul.f32 %v1062_v62, %v2283_v26  ;;  %v1403_v62 = vld [vmem:[#allocation2 + $0x8] sm:$0xff] }
 0x515   :  { %v1100_v58 = vadd.f32 3.0, %v1092_v55  ;;  %v1101_v8 = vadd.f32 3.0, %v1093_v22 }
 0x516   :  { %v1057_v23 = vpop.permute.xlu1 %1056 }
 0x517   :  { %v1108_v9 = vmax.f32 %v1100_v58, 0.0  ;;  %v1109_v40 = vmax.f32 %v1101_v8, 0.0  ;;  %v1088_v56 = vmul.f32 %v1057_v23, %v2205_v42  ;;  %v1089_v24 = vmul.f32 %v1057_v23, %v2213_v45 }
 0x519   :  { %v1116_v37 = vmin.f32 %v1108_v9, 6.0  ;;  %v1117_v10 = vmin.f32 %v1109_v40, 6.0  ;;  %v1096_v2 = vadd.f32 3.0, %v1088_v56  ;;  %v1097_v20 = vadd.f32 3.0, %v1089_v24  ;;  %v1404_v9 = vld [vmem:[#allocation2 + $0x10] sm:$0xff] }
 0x51b   :  { %v1104_v16 = vmax.f32 %v1096_v2, 0.0  ;;  %v1105_v32 = vmax.f32 %v1097_v20, 0.0  ;;  %v1074_v39 = vpop.permute.xlu1 %1073  ;;  %v1124_v54 = vmul.f32 0.16666667, %v1116_v37  ;;  %v1125_v49 = vmul.f32 0.16666667, %v1117_v10 }
 0x51c   :  { %v1090_v61 = vmul.f32 %v1074_v39, %v2262_v43  ;;  %v1091_v26 = vmul.f32 %v1074_v39, %v2265_v6 }
 0x51d   :  { %v1112_v51 = vmin.f32 %v1104_v16, 6.0  ;;  %v1113_v21 = vmin.f32 %v1105_v32, 6.0  ;;  %v1132_v44 = vmul.f32 %v1124_v54, %v1092_v55  ;;  %v1133_v15 = vmul.f32 %v1125_v49, %v1093_v22 }
 0x51e   :  { %v1098_v28 = vadd.f32 3.0, %v1090_v61  ;;  %v1099_v60 = vadd.f32 3.0, %v1091_v26 }
 0x51f   :  { %v1120_v42 = vmul.f32 0.16666667, %v1112_v51  ;;  %v1121_v36 = vmul.f32 0.16666667, %v1113_v21  ;;  %v1078_v45 = vpop.permute.xlu1 %1077 }
 0x520   :  { %v1106_v3 = vmax.f32 %v1098_v28, 0.0  ;;  %v1107_v0 = vmax.f32 %v1099_v60, 0.0  ;;  %v1094_v38 = vmul.f32 %v1078_v45, %v2291_v41  ;;  %v1095_v33 = vmul.f32 %v1078_v45, %v2286_v5  ;;  %v1141_v41 = vpop.permute.xlu0 %1140 }
 0x521   :  { %v1128_v43 = vmul.f32 %v1120_v42, %v1088_v56  ;;  %v1129_v13 = vmul.f32 %v1121_v36, %v1089_v24  ;;  %v1405_v56 = vld [vmem:[#allocation2 + $0x18] sm:$0xff] }
 0x522   :  { %v1114_v6 = vmin.f32 %v1106_v3, 6.0  ;;  %v1115_v17 = vmin.f32 %v1107_v0, 6.0  ;;  %v1102_v7 = vadd.f32 3.0, %v1094_v38  ;;  %v1103_v19 = vadd.f32 3.0, %v1095_v33 }
 0x523   :  { %v1341_v12 = vpack.c.bf16 %v1132_v44, %v1128_v43  ;;  %v1339_v18 = vpack.c.bf16 %v1133_v15, %v1129_v13 }
 0x524   :  { %v1110_v11 = vmax.f32 %v1102_v7, 0.0  ;;  %v1111_v63 = vmax.f32 %v1103_v19, 0.0  ;;  %v1122_v29 = vmul.f32 0.16666667, %v1114_v6  ;;  %v1123_v25 = vmul.f32 0.16666667, %v1115_v17  ;;  %v1138_v30 = vpop.permute.xlu1 %1137 }
 0x525   :  { %1340 = vmatprep.subr.bf16.mxu0 %v1339_v18 }
 0x526   :  { %v1118_v59 = vmin.f32 %v1110_v11, 6.0  ;;  %v1119_v4 = vmin.f32 %v1111_v63, 6.0  ;;  %1342 = vmatpush1.bf16.msra.mxu0 %v1341_v12  ;;  %v1130_v1 = vmul.f32 %v1122_v29, %v1090_v61  ;;  %v1131_v52 = vmul.f32 %v1123_v25, %v1091_v26 }
 0x528   :  { %v1126_v5 = vmul.f32 0.16666667, %v1118_v59  ;;  %v1127_v14 = vmul.f32 0.16666667, %v1119_v4 }
 0x529   :  { %1316 = vmatmul.mubr.msk.f32.vlgmr.msra.gmra.mrb[6].mxu0 %vm881_vm2, %v1141_v41 }
 0x52a   :  { %v1134_v48 = vmul.f32 %v1126_v5, %v1094_v38  ;;  %v1135_v46 = vmul.f32 %v1127_v14, %v1095_v33 }
 0x52c   :  { %v1345_v57 = vpack.c.bf16 %v1134_v48, %v1130_v1  ;;  %v1343_v35 = vpack.c.bf16 %v1135_v46, %v1131_v52 }
 0x52e   :  { %1344 = vmatprep.subr.bf16.mxu1 %v1343_v35 }
 0x52f   :  { %1346 = vmatpush1.bf16.msra.mxu1 %v1345_v57 }
 0x532   :  { %1317 = vmatmul.mubr.msk.f32.vlgmr.msra.gmra.mrb[6].mxu1 %vm881_vm2, %v1141_v41 }
 0x5fc   :  { %v1210_v27 = vpop.f32.mrb[6].mxu0 }
 0x5fd   :  { %v1211_v34 = vadd.f32 %v1210_v27, %v1138_v30  ;;  %v1212_v50 = vpop.f32.mrb[7].mxu0 }
 0x5fe   :  { %v1213_v31 = vadd.f32 %v1212_v50, %v1138_v30 }
 0x5ff   :  { %v1286_v53 = vadd.f32 %v1402_v47, %v1211_v34 }
 0x600   :  { %v1287_v55 = vadd.f32 %v1403_v62, %v1213_v31 }
 0x601   :  { %1290 = vst [vmem:[#allocation5] sm:$0xff] %v1286_v53 }
 0x602   :  { %1291 = vst [vmem:[#allocation5 + $0x8] sm:$0xff] %v1287_v55 }
 0x605   :  { %v1281_v22 = vpop.f32.mrb[6].mxu1 }
 0x606   :  { %v1282_v58 = vadd.f32 %v1281_v22, %v1138_v30  ;;  %v1283_v8 = vpop.f32.mrb[7].mxu1 }
 0x607   :  { %v1284_v23 = vadd.f32 %v1283_v8, %v1138_v30 }
 0x608   :  { %v1288_v40 = vadd.f32 %v1404_v9, %v1282_v58 }
 0x609   :  { %v1289_v24 = vadd.f32 %v1405_v56, %v1284_v23 }
 0x60a   :  { %1292 = vst [vmem:[#allocation5 + $0x10] sm:$0xff] %v1288_v40 }
 0x60b   :  { %1293 = vst [vmem:[#allocation5 + $0x18] sm:$0xff] %v1289_v24 }
 0x60c   :  { %1439 = shalt.err (!%p1436_p12)
}
 0x60d   :  { %s1440_s13 = scalar_lea.hbm %s2340_s2, 512 }
 0x60e   :  { %p1441_p13 = scmp.ne.s32.totalorder %s2340_s2, %s1440_s13  ;;  %p1444_p0 = scmp.lt.u32.totalorder %s1440_s13, %s2340_s2 }
 0x610   :  { %p1446_p1 = pnand %p1444_p0, %p1441_p13 }
 0x612   :  { %1449 = shalt.err (!%p1446_p1)
}
 0x613   :  { %1303 = dma.vmem_to_hbm [thread:$0]  %s1301_s9, 512, %s2340_s2, [#allocation4]  }
 0x614   :  { %1452 = dma.done.wait [#allocation4], 512  }
 0x615   :  { %1453 = vsyncadd [#allocation4], 4294966784 }
 0x616   :  { %1307 = vsyncpa [#allocation3], 1 }
 0x617   :  { %1308 = vsyncpa [#allocation4], 1 }

</bundles_post_ra>
